<compile_context>
chip_gen: v6e
topology: v6e:2x2x1
jax: 0.10.0
libtpu: 0.0.40
codegen_flags: <defaults>
</compile_context>

<pallas_src>
import functools

import jax
import jax.numpy as jnp
from jax.experimental import pallas as pl
from jax.experimental.pallas import tpu as pltpu


def _bem_kernel(low_b_ref, high_b_ref, low_h_ref, high_h_ref,
                w_ref, scale_ref, bias_ref, out_ref):
    # low_b_ref / high_b_ref : (1, TH, W, C)  body rows of this H tile
    # low_h_ref / high_h_ref : (1, 2, W, C)   [row above tile, row below tile]
    # w_ref                  : (9, C, C)      3x3 taps, tap index = dy*3 + dx
    # scale_ref / bias_ref   : (1, C)         folded BatchNorm affine
    # out_ref                : (1, TH, W, C)
    _, TH, W, C = low_b_ref.shape
    f32 = jnp.float32

    lb = low_b_ref[0].astype(f32)
    hb = high_b_ref[0].astype(f32)
    lh = low_h_ref[0].astype(f32)
    hh = high_h_ref[0].astype(f32)

    # edge gate: x = sigmoid(low) * high, only on rows the taps consume.
    # Border halo rows are zeros: sigmoid(0) * 0 = 0 == zero padding of x.
    xb = jax.nn.sigmoid(lb) * hb            # (TH, W, C)
    xh = jax.nn.sigmoid(lh) * hh            # (2, W, C)

    # assemble (TH+2, W+2, C): halo rows above/below + zero columns left/right
    xp = jnp.concatenate([xh[0:1], xb, xh[1:2]], axis=0)       # (TH+2, W, C)
    zcol = jnp.zeros((TH + 2, 1, C), f32)
    xpw = jnp.concatenate([zcol, xp, zcol], axis=1)            # (TH+2, W+2, C)

    # hoist the sublane-direction (dx) shifts out of the 9-tap loop
    xdx = [xpw[:, dx:dx + W, :] for dx in range(3)]            # 3x (TH+2, W, C)

    acc = jnp.zeros((TH * W, C), f32)
    for dy in range(3):                      # static, unrolled 3x3 taps
        for dx in range(3):
            patch = xdx[dx][dy:dy + TH].reshape(TH * W, C)     # leading-axis slice
            acc = acc + jnp.dot(patch, w_ref[dy * 3 + dx].astype(f32),
                                preferred_element_type=jnp.float32)

    # folded BatchNorm affine + ReLU
    y = acc * scale_ref[0].astype(f32) + bias_ref[0].astype(f32)
    y = jnp.maximum(y, 0.0)

    # residual with the unpadded high-level features
    out_ref[...] = (hb + y.reshape(TH, W, C))[None].astype(out_ref.dtype)


def _pick_tile_h(H, W, C, max_tile_bytes=1 << 20):
    """Largest divisor of H whose f32 (TH, W, C) body block fits the budget."""
    row_bytes = max(W * C * 4, 1)
    best = 1
    for th in range(1, H + 1):
        if H % th == 0 and th * row_bytes <= max_tile_bytes:
            best = th
    return best


def _row_halos(x, tile_h):
    """(N,H,W,C) -> (N, 2*nt, W, C); [:, 2t]=row t*tile_h-1, [:, 2t+1]=row (t+1)*tile_h.

    Image-border halo rows are zeros.  Only 2 rows per tile are gathered, so
    the extra HBM traffic is ~2/tile_h of the tensor (vs. a full padded copy).
    """
    N, H, W, C = x.shape
    nt = H // tile_h
    zrow = jnp.zeros((N, 1, W, C), x.dtype)
    if nt == 1:
        top, bot = zrow, zrow
    else:
        top = jnp.concatenate([zrow, x[:, tile_h - 1::tile_h][:, :nt - 1]], axis=1)
        bot = jnp.concatenate([x[:, tile_h::tile_h], zrow], axis=1)
    return jnp.stack([top, bot], axis=2).reshape(N, 2 * nt, W, C)


@functools.partial(jax.jit, static_argnames=("tile_h",))
def boundary_enhance_forward(low_nchw, high_nchw, conv_w, bn_gamma, bn_beta,
                             bn_mean, bn_var, eps=1e-5, tile_h=None):
    """low/high: (N, C, H, W) float32; conv_w: (C, C, 3, 3) OIHW (no bias)."""
    N, C, H, W = low_nchw.shape
    if tile_h is None:
        tile_h = _pick_tile_h(H, W, C)
    assert H % tile_h == 0, "tile_h must divide H"
    nt = H // tile_h

    # NCHW -> NHWC (lane dim = channels); left to XLA so it can fuse with the
    # halo gathers below (no separate full-pad pass any more).
    low = jnp.transpose(low_nchw, (0, 2, 3, 1))
    high = jnp.transpose(high_nchw, (0, 2, 3, 1))
    low_halo = _row_halos(low, tile_h)
    high_halo = _row_halos(high, tile_h)

    # (C_out, C_in, 3, 3) -> (9, C_in, C_out), tap index = dy*3 + dx
    w9 = jnp.transpose(conv_w, (2, 3, 1, 0)).reshape(9, C, C)

    # fold BatchNorm (inference mode) into a per-channel affine
    scale = bn_gamma / jnp.sqrt(bn_var + eps)
    bias = bn_beta - bn_mean * scale
    scale = scale.reshape(1, C).astype(jnp.float32)
    bias = bias.reshape(1, C).astype(jnp.float32)

    out_nhwc = pl.pallas_call(
        _bem_kernel,
        out_shape=jax.ShapeDtypeStruct((N, H, W, C), jnp.float32),
        grid_spec=pltpu.PrefetchScalarGridSpec(
            num_scalar_prefetch=0,
            grid=(N, nt),
            in_specs=[
                pl.BlockSpec((1, tile_h, W, C), lambda b, t: (b, t, 0, 0)),   # low body
                pl.BlockSpec((1, tile_h, W, C), lambda b, t: (b, t, 0, 0)),   # high body
                pl.BlockSpec((1, 2, W, C), lambda b, t: (b, t, 0, 0)),        # low halo rows
                pl.BlockSpec((1, 2, W, C), lambda b, t: (b, t, 0, 0)),        # high halo rows
                pl.BlockSpec((9, C, C), lambda b, t: (0, 0, 0)),              # conv taps
                pl.BlockSpec((1, C), lambda b, t: (0, 0)),                    # BN scale
                pl.BlockSpec((1, C), lambda b, t: (0, 0)),                    # BN bias
            ],
            out_specs=pl.BlockSpec((1, tile_h, W, C), lambda b, t: (b, t, 0, 0)),
        ),
        compiler_params=pltpu.CompilerParams(
            dimension_semantics=("parallel", "parallel"),
            vmem_limit_bytes=32 * 1024 * 1024,
        ),
    )(low, high, low_halo, high_halo, w9, scale, bias)

    return jnp.transpose(out_nhwc, (0, 3, 1, 2))  # back to NCHW


def _reference(low, high, conv_w, gamma, beta, mean, var, eps=1e-5):
    edge = jax.nn.sigmoid(low)
    x = edge * high
    y = jax.lax.conv_general_dilated(
        x, conv_w, window_strides=(1, 1), padding=((1, 1), (1, 1)),
        dimension_numbers=("NCHW", "OIHW", "NCHW"))
    c = y.shape[1]
    y = ((y - mean.reshape(1, c, 1, 1)) / jnp.sqrt(var.reshape(1, c, 1, 1) + eps)
         * gamma.reshape(1, c, 1, 1) + beta.reshape(1, c, 1, 1))
    y = jnp.maximum(y, 0.0)
    return high + y


if __name__ == "__main__":
    N, C, H, W = 2, 4, 16, 16
    key = jax.random.PRNGKey(0)
    k_low, k_high, k_w, k_g, k_b = jax.random.split(key, 5)

    low = jax.random.normal(k_low, (N, C, H, W), jnp.float32)
    high = jax.random.normal(k_high, (N, C, H, W), jnp.float32)

    # deterministic parameter init (fresh BatchNorm2d: running_mean=0, var=1)
    conv_w = jax.random.normal(k_w, (C, C, 3, 3), jnp.float32) * 0.1
    bn_gamma = 1.0 + 0.1 * jax.random.normal(k_g, (C,), jnp.float32)
    bn_beta = 0.1 * jax.random.normal(k_b, (C,), jnp.float32)
    bn_mean = jnp.zeros((C,), jnp.float32)
    bn_var = jnp.ones((C,), jnp.float32)

    ref = _reference(low, high, conv_w, bn_gamma, bn_beta, bn_mean, bn_var)

    # H-tiled path (two 8-row tiles -> exercises the halo machinery) ...
    out_tiled = boundary_enhance_forward(low, high, conv_w, bn_gamma, bn_beta,
                                         bn_mean, bn_var, tile_h=8)
    out_tiled = jax.block_until_ready(out_tiled)
    # ... and the automatically picked single-tile path.
    out_auto = boundary_enhance_forward(low, high, conv_w, bn_gamma, bn_beta,
                                        bn_mean, bn_var)
    out_auto = jax.block_until_ready(out_auto)

    assert out_tiled.shape == (N, C, H, W)
    assert jnp.allclose(out_tiled, ref, atol=1e-4, rtol=1e-4), "tiled mismatch vs reference"
    assert jnp.allclose(out_auto, ref, atol=1e-4, rtol=1e-4), "auto-tile mismatch vs reference"
    print("KERNEL_OK")
</pallas_src>

<mosaic_0001>
module attributes {stable_mosaic.version = 11 : i64} {
  func.func @_bem_kernel(%arg0: i32, %arg1: i32, %arg2: memref<1x8x16x4xf32, #tpu.memory_space<vmem>>, %arg3: memref<1x8x16x4xf32, #tpu.memory_space<vmem>>, %arg4: memref<1x2x16x4xf32, #tpu.memory_space<vmem>>, %arg5: memref<1x2x16x4xf32, #tpu.memory_space<vmem>>, %arg6: memref<9x4x4xf32, #tpu.memory_space<vmem>>, %arg7: memref<1x4xf32, #tpu.memory_space<vmem>>, %arg8: memref<1x4xf32, #tpu.memory_space<vmem>>, %arg9: memref<1x8x16x4xf32, #tpu.memory_space<vmem>>) attributes {dimension_semantics = [#tpu.dimension_semantics<parallel>, #tpu.dimension_semantics<parallel>], iteration_bounds = array<i64: 2, 2>, scalar_prefetch = 0 : i64, scratch_operands = 0 : i64, tpu.core_type = #tpu.core_type<tc>, window_params = [{transform_indices = @transform_0, window_bounds = array<i64: 1, 8, 16, 4>}, {transform_indices = @transform_1, window_bounds = array<i64: 1, 8, 16, 4>}, {transform_indices = @transform_2, window_bounds = array<i64: 1, 2, 16, 4>}, {transform_indices = @transform_3, window_bounds = array<i64: 1, 2, 16, 4>}, {pipeline_mode = #tpu.pipeline_mode<synchronous>, transform_indices = @transform_4, window_bounds = array<i64: 9, 4, 4>}, {pipeline_mode = #tpu.pipeline_mode<synchronous>, transform_indices = @transform_5, window_bounds = array<i64: 1, 4>}, {pipeline_mode = #tpu.pipeline_mode<synchronous>, transform_indices = @transform_6, window_bounds = array<i64: 1, 4>}, {transform_indices = @transform_7, window_bounds = array<i64: 1, 8, 16, 4>}]} {
    %c0 = arith.constant 0 : index
    %c0_0 = arith.constant 0 : index
    %c0_1 = arith.constant 0 : index
    %c0_2 = arith.constant 0 : index
    %0 = vector.load %arg2[%c0, %c0_0, %c0_1, %c0_2] : memref<1x8x16x4xf32, #tpu.memory_space<vmem>>, vector<1x8x16x4xf32>
    %1 = vector.shape_cast %0 : vector<1x8x16x4xf32> to vector<8x16x4xf32>
    %c0_3 = arith.constant 0 : index
    %c0_4 = arith.constant 0 : index
    %c0_5 = arith.constant 0 : index
    %c0_6 = arith.constant 0 : index
    %2 = vector.load %arg3[%c0_3, %c0_4, %c0_5, %c0_6] : memref<1x8x16x4xf32, #tpu.memory_space<vmem>>, vector<1x8x16x4xf32>
    %3 = vector.shape_cast %2 : vector<1x8x16x4xf32> to vector<8x16x4xf32>
    %c0_7 = arith.constant 0 : index
    %c0_8 = arith.constant 0 : index
    %c0_9 = arith.constant 0 : index
    %c0_10 = arith.constant 0 : index
    %4 = vector.load %arg4[%c0_7, %c0_8, %c0_9, %c0_10] : memref<1x2x16x4xf32, #tpu.memory_space<vmem>>, vector<1x2x16x4xf32>
    %5 = vector.shape_cast %4 : vector<1x2x16x4xf32> to vector<2x16x4xf32>
    %c0_11 = arith.constant 0 : index
    %c0_12 = arith.constant 0 : index
    %c0_13 = arith.constant 0 : index
    %c0_14 = arith.constant 0 : index
    %6 = vector.load %arg5[%c0_11, %c0_12, %c0_13, %c0_14] : memref<1x2x16x4xf32, #tpu.memory_space<vmem>>, vector<1x2x16x4xf32>
    %7 = vector.shape_cast %6 : vector<1x2x16x4xf32> to vector<2x16x4xf32>
    %8 = arith.negf %1 : vector<8x16x4xf32>
    %9 = math.exp %8 : vector<8x16x4xf32>
    %cst = arith.constant 1.000000e+00 : f32
    %10 = vector.broadcast %cst : f32 to vector<8x16x4xf32>
    %11 = arith.addf %10, %9 : vector<8x16x4xf32>
    %12 = arith.divf %10, %11 : vector<8x16x4xf32>
    %13 = arith.mulf %12, %3 : vector<8x16x4xf32>
    %14 = arith.negf %5 : vector<2x16x4xf32>
    %15 = math.exp %14 : vector<2x16x4xf32>
    %cst_15 = arith.constant 1.000000e+00 : f32
    %16 = vector.broadcast %cst_15 : f32 to vector<2x16x4xf32>
    %17 = arith.addf %16, %15 : vector<2x16x4xf32>
    %18 = arith.divf %16, %17 : vector<2x16x4xf32>
    %19 = arith.mulf %18, %7 : vector<2x16x4xf32>
    %20 = vector.extract_strided_slice %19 {offsets = [0, 0, 0], sizes = [1, 16, 4], strides = [1, 1, 1]} : vector<2x16x4xf32> to vector<1x16x4xf32>
    %21 = vector.extract_strided_slice %19 {offsets = [1, 0, 0], sizes = [1, 16, 4], strides = [1, 1, 1]} : vector<2x16x4xf32> to vector<1x16x4xf32>
    %22 = tpu.concatenate %20, %13, %21 in 0 : vector<1x16x4xf32>, vector<8x16x4xf32>, vector<1x16x4xf32> -> vector<10x16x4xf32>
    %cst_16 = arith.constant 0.000000e+00 : f32
    %23 = vector.broadcast %cst_16 : f32 to vector<10x1x4xf32>
    %24 = tpu.concatenate %23, %22, %23 in 1 : vector<10x1x4xf32>, vector<10x16x4xf32>, vector<10x1x4xf32> -> vector<10x18x4xf32>
    %25 = vector.extract_strided_slice %24 {offsets = [0, 0, 0], sizes = [10, 16, 4], strides = [1, 1, 1]} : vector<10x18x4xf32> to vector<10x16x4xf32>
    %26 = vector.extract_strided_slice %24 {offsets = [0, 1, 0], sizes = [10, 16, 4], strides = [1, 1, 1]} : vector<10x18x4xf32> to vector<10x16x4xf32>
    %27 = vector.extract_strided_slice %24 {offsets = [0, 2, 0], sizes = [10, 16, 4], strides = [1, 1, 1]} : vector<10x18x4xf32> to vector<10x16x4xf32>
    %cst_17 = arith.constant 0.000000e+00 : f32
    %28 = vector.broadcast %cst_17 : f32 to vector<128x4xf32>
    %29 = vector.extract_strided_slice %25 {offsets = [0, 0, 0], sizes = [8, 16, 4], strides = [1, 1, 1]} : vector<10x16x4xf32> to vector<8x16x4xf32>
    %30 = vector.shape_cast %29 : vector<8x16x4xf32> to vector<128x4xf32>
    %c0_18 = arith.constant 0 : index
    %c0_19 = arith.constant 0 : index
    %c0_20 = arith.constant 0 : index
    %31 = vector.load %arg6[%c0_18, %c0_19, %c0_20] : memref<9x4x4xf32, #tpu.memory_space<vmem>>, vector<1x4x4xf32>
    %32 = vector.shape_cast %31 : vector<1x4x4xf32> to vector<4x4xf32>
    %cst_21 = arith.constant dense<0.000000e+00> : vector<128x4xf32>
    %33 = tpu.matmul %30, %32, %cst_21 {dimension_numbers = #tpu.dot_dimension_numbers<[1], [0], [0], [1], [0, 0, 1, 1], [], []>} : vector<128x4xf32>, vector<4x4xf32>, vector<128x4xf32> -> vector<128x4xf32>
    %34 = arith.addf %28, %33 : vector<128x4xf32>
    %35 = vector.extract_strided_slice %26 {offsets = [0, 0, 0], sizes = [8, 16, 4], strides = [1, 1, 1]} : vector<10x16x4xf32> to vector<8x16x4xf32>
    %36 = vector.shape_cast %35 : vector<8x16x4xf32> to vector<128x4xf32>
    %c1 = arith.constant 1 : index
    %c0_22 = arith.constant 0 : index
    %c0_23 = arith.constant 0 : index
    %37 = vector.load %arg6[%c1, %c0_22, %c0_23] : memref<9x4x4xf32, #tpu.memory_space<vmem>>, vector<1x4x4xf32>
    %38 = vector.shape_cast %37 : vector<1x4x4xf32> to vector<4x4xf32>
    %cst_24 = arith.constant dense<0.000000e+00> : vector<128x4xf32>
    %39 = tpu.matmul %36, %38, %cst_24 {dimension_numbers = #tpu.dot_dimension_numbers<[1], [0], [0], [1], [0, 0, 1, 1], [], []>} : vector<128x4xf32>, vector<4x4xf32>, vector<128x4xf32> -> vector<128x4xf32>
    %40 = arith.addf %34, %39 : vector<128x4xf32>
    %41 = vector.extract_strided_slice %27 {offsets = [0, 0, 0], sizes = [8, 16, 4], strides = [1, 1, 1]} : vector<10x16x4xf32> to vector<8x16x4xf32>
    %42 = vector.shape_cast %41 : vector<8x16x4xf32> to vector<128x4xf32>
    %c2 = arith.constant 2 : index
    %c0_25 = arith.constant 0 : index
    %c0_26 = arith.constant 0 : index
    %43 = vector.load %arg6[%c2, %c0_25, %c0_26] : memref<9x4x4xf32, #tpu.memory_space<vmem>>, vector<1x4x4xf32>
    %44 = vector.shape_cast %43 : vector<1x4x4xf32> to vector<4x4xf32>
    %cst_27 = arith.constant dense<0.000000e+00> : vector<128x4xf32>
    %45 = tpu.matmul %42, %44, %cst_27 {dimension_numbers = #tpu.dot_dimension_numbers<[1], [0], [0], [1], [0, 0, 1, 1], [], []>} : vector<128x4xf32>, vector<4x4xf32>, vector<128x4xf32> -> vector<128x4xf32>
    %46 = arith.addf %40, %45 : vector<128x4xf32>
    %47 = vector.extract_strided_slice %25 {offsets = [1, 0, 0], sizes = [8, 16, 4], strides = [1, 1, 1]} : vector<10x16x4xf32> to vector<8x16x4xf32>
    %48 = vector.shape_cast %47 : vector<8x16x4xf32> to vector<128x4xf32>
    %c3 = arith.constant 3 : index
    %c0_28 = arith.constant 0 : index
    %c0_29 = arith.constant 0 : index
    %49 = vector.load %arg6[%c3, %c0_28, %c0_29] : memref<9x4x4xf32, #tpu.memory_space<vmem>>, vector<1x4x4xf32>
    %50 = vector.shape_cast %49 : vector<1x4x4xf32> to vector<4x4xf32>
    %cst_30 = arith.constant dense<0.000000e+00> : vector<128x4xf32>
    %51 = tpu.matmul %48, %50, %cst_30 {dimension_numbers = #tpu.dot_dimension_numbers<[1], [0], [0], [1], [0, 0, 1, 1], [], []>} : vector<128x4xf32>, vector<4x4xf32>, vector<128x4xf32> -> vector<128x4xf32>
    %52 = arith.addf %46, %51 : vector<128x4xf32>
    %53 = vector.extract_strided_slice %26 {offsets = [1, 0, 0], sizes = [8, 16, 4], strides = [1, 1, 1]} : vector<10x16x4xf32> to vector<8x16x4xf32>
    %54 = vector.shape_cast %53 : vector<8x16x4xf32> to vector<128x4xf32>
    %c4 = arith.constant 4 : index
    %c0_31 = arith.constant 0 : index
    %c0_32 = arith.constant 0 : index
    %55 = vector.load %arg6[%c4, %c0_31, %c0_32] : memref<9x4x4xf32, #tpu.memory_space<vmem>>, vector<1x4x4xf32>
    %56 = vector.shape_cast %55 : vector<1x4x4xf32> to vector<4x4xf32>
    %cst_33 = arith.constant dense<0.000000e+00> : vector<128x4xf32>
    %57 = tpu.matmul %54, %56, %cst_33 {dimension_numbers = #tpu.dot_dimension_numbers<[1], [0], [0], [1], [0, 0, 1, 1], [], []>} : vector<128x4xf32>, vector<4x4xf32>, vector<128x4xf32> -> vector<128x4xf32>
    %58 = arith.addf %52, %57 : vector<128x4xf32>
    %59 = vector.extract_strided_slice %27 {offsets = [1, 0, 0], sizes = [8, 16, 4], strides = [1, 1, 1]} : vector<10x16x4xf32> to vector<8x16x4xf32>
    %60 = vector.shape_cast %59 : vector<8x16x4xf32> to vector<128x4xf32>
    %c5 = arith.constant 5 : index
    %c0_34 = arith.constant 0 : index
    %c0_35 = arith.constant 0 : index
    %61 = vector.load %arg6[%c5, %c0_34, %c0_35] : memref<9x4x4xf32, #tpu.memory_space<vmem>>, vector<1x4x4xf32>
    %62 = vector.shape_cast %61 : vector<1x4x4xf32> to vector<4x4xf32>
    %cst_36 = arith.constant dense<0.000000e+00> : vector<128x4xf32>
    %63 = tpu.matmul %60, %62, %cst_36 {dimension_numbers = #tpu.dot_dimension_numbers<[1], [0], [0], [1], [0, 0, 1, 1], [], []>} : vector<128x4xf32>, vector<4x4xf32>, vector<128x4xf32> -> vector<128x4xf32>
    %64 = arith.addf %58, %63 : vector<128x4xf32>
    %65 = vector.extract_strided_slice %25 {offsets = [2, 0, 0], sizes = [8, 16, 4], strides = [1, 1, 1]} : vector<10x16x4xf32> to vector<8x16x4xf32>
    %66 = vector.shape_cast %65 : vector<8x16x4xf32> to vector<128x4xf32>
    %c6 = arith.constant 6 : index
    %c0_37 = arith.constant 0 : index
    %c0_38 = arith.constant 0 : index
    %67 = vector.load %arg6[%c6, %c0_37, %c0_38] : memref<9x4x4xf32, #tpu.memory_space<vmem>>, vector<1x4x4xf32>
    %68 = vector.shape_cast %67 : vector<1x4x4xf32> to vector<4x4xf32>
    %cst_39 = arith.constant dense<0.000000e+00> : vector<128x4xf32>
    %69 = tpu.matmul %66, %68, %cst_39 {dimension_numbers = #tpu.dot_dimension_numbers<[1], [0], [0], [1], [0, 0, 1, 1], [], []>} : vector<128x4xf32>, vector<4x4xf32>, vector<128x4xf32> -> vector<128x4xf32>
    %70 = arith.addf %64, %69 : vector<128x4xf32>
    %71 = vector.extract_strided_slice %26 {offsets = [2, 0, 0], sizes = [8, 16, 4], strides = [1, 1, 1]} : vector<10x16x4xf32> to vector<8x16x4xf32>
    %72 = vector.shape_cast %71 : vector<8x16x4xf32> to vector<128x4xf32>
    %c7 = arith.constant 7 : index
    %c0_40 = arith.constant 0 : index
    %c0_41 = arith.constant 0 : index
    %73 = vector.load %arg6[%c7, %c0_40, %c0_41] : memref<9x4x4xf32, #tpu.memory_space<vmem>>, vector<1x4x4xf32>
    %74 = vector.shape_cast %73 : vector<1x4x4xf32> to vector<4x4xf32>
    %cst_42 = arith.constant dense<0.000000e+00> : vector<128x4xf32>
    %75 = tpu.matmul %72, %74, %cst_42 {dimension_numbers = #tpu.dot_dimension_numbers<[1], [0], [0], [1], [0, 0, 1, 1], [], []>} : vector<128x4xf32>, vector<4x4xf32>, vector<128x4xf32> -> vector<128x4xf32>
    %76 = arith.addf %70, %75 : vector<128x4xf32>
    %77 = vector.extract_strided_slice %27 {offsets = [2, 0, 0], sizes = [8, 16, 4], strides = [1, 1, 1]} : vector<10x16x4xf32> to vector<8x16x4xf32>
    %78 = vector.shape_cast %77 : vector<8x16x4xf32> to vector<128x4xf32>
    %c8 = arith.constant 8 : index
    %c0_43 = arith.constant 0 : index
    %c0_44 = arith.constant 0 : index
    %79 = vector.load %arg6[%c8, %c0_43, %c0_44] : memref<9x4x4xf32, #tpu.memory_space<vmem>>, vector<1x4x4xf32>
    %80 = vector.shape_cast %79 : vector<1x4x4xf32> to vector<4x4xf32>
    %cst_45 = arith.constant dense<0.000000e+00> : vector<128x4xf32>
    %81 = tpu.matmul %78, %80, %cst_45 {dimension_numbers = #tpu.dot_dimension_numbers<[1], [0], [0], [1], [0, 0, 1, 1], [], []>} : vector<128x4xf32>, vector<4x4xf32>, vector<128x4xf32> -> vector<128x4xf32>
    %82 = arith.addf %76, %81 : vector<128x4xf32>
    %c0_46 = arith.constant 0 : index
    %c0_47 = arith.constant 0 : index
    %83 = vector.load %arg7[%c0_46, %c0_47] : memref<1x4xf32, #tpu.memory_space<vmem>>, vector<1x4xf32>
    %84 = vector.shape_cast %83 : vector<1x4xf32> to vector<4xf32>
    %85 = vector.shape_cast %84 : vector<4xf32> to vector<1x4xf32>
    %86 = vector.broadcast %85 : vector<1x4xf32> to vector<128x4xf32>
    %87 = arith.mulf %82, %86 : vector<128x4xf32>
    %c0_48 = arith.constant 0 : index
    %c0_49 = arith.constant 0 : index
    %88 = vector.load %arg8[%c0_48, %c0_49] : memref<1x4xf32, #tpu.memory_space<vmem>>, vector<1x4xf32>
    %89 = vector.shape_cast %88 : vector<1x4xf32> to vector<4xf32>
    %90 = vector.shape_cast %89 : vector<4xf32> to vector<1x4xf32>
    %91 = vector.broadcast %90 : vector<1x4xf32> to vector<128x4xf32>
    %92 = arith.addf %87, %91 : vector<128x4xf32>
    %cst_50 = arith.constant 0.000000e+00 : f32
    %93 = vector.broadcast %cst_50 : f32 to vector<128x4xf32>
    %94 = arith.maximumf %92, %93 : vector<128x4xf32>
    %95 = vector.shape_cast %94 : vector<128x4xf32> to vector<8x16x4xf32>
    %96 = arith.addf %3, %95 : vector<8x16x4xf32>
    %97 = vector.shape_cast %96 : vector<8x16x4xf32> to vector<1x8x16x4xf32>
    %c0_51 = arith.constant 0 : index
    %c0_52 = arith.constant 0 : index
    %c0_53 = arith.constant 0 : index
    %c0_54 = arith.constant 0 : index
    %98 = vector.load %arg9[%c0_51, %c0_52, %c0_53, %c0_54] : memref<1x8x16x4xf32, #tpu.memory_space<vmem>>, vector<1x8x16x4xf32>
    tpu.vector_store %arg9[%c0_51, %c0_52, %c0_53, %c0_54], %97 {strides = array<i32>} : memref<1x8x16x4xf32, #tpu.memory_space<vmem>>, vector<1x8x16x4xf32>,
    return
  }
  func.func @transform_0(%arg0: i32, %arg1: i32) -> (i32, i32, i32, i32) {
    %c0_i32 = arith.constant 0 : i32
    %c0_i32_0 = arith.constant 0 : i32
    %c0_i32_1 = arith.constant 0 : i32
    return %arg0, %arg1, %c0_i32, %c0_i32_0 : i32, i32, i32, i32
  }
  func.func @transform_1(%arg0: i32, %arg1: i32) -> (i32, i32, i32, i32) {
    %c0_i32 = arith.constant 0 : i32
    %c0_i32_0 = arith.constant 0 : i32
    %c0_i32_1 = arith.constant 0 : i32
    return %arg0, %arg1, %c0_i32, %c0_i32_0 : i32, i32, i32, i32
  }
  func.func @transform_2(%arg0: i32, %arg1: i32) -> (i32, i32, i32, i32) {
    %c0_i32 = arith.constant 0 : i32
    %c0_i32_0 = arith.constant 0 : i32
    %c0_i32_1 = arith.constant 0 : i32
    return %arg0, %arg1, %c0_i32, %c0_i32_0 : i32, i32, i32, i32
  }
  func.func @transform_3(%arg0: i32, %arg1: i32) -> (i32, i32, i32, i32) {
    %c0_i32 = arith.constant 0 : i32
    %c0_i32_0 = arith.constant 0 : i32
    %c0_i32_1 = arith.constant 0 : i32
    return %arg0, %arg1, %c0_i32, %c0_i32_0 : i32, i32, i32, i32
  }
  func.func @transform_4(%arg0: i32, %arg1: i32) -> (i32, i32, i32) {
    %c0_i32 = arith.constant 0 : i32
    %c0_i32_0 = arith.constant 0 : i32
    %c0_i32_1 = arith.constant 0 : i32
    %c0_i32_2 = arith.constant 0 : i32
    return %c0_i32, %c0_i32_0, %c0_i32_1 : i32, i32, i32
  }
  func.func @transform_5(%arg0: i32, %arg1: i32) -> (i32, i32) {
    %c0_i32 = arith.constant 0 : i32
    %c0_i32_0 = arith.constant 0 : i32
    %c0_i32_1 = arith.constant 0 : i32
    return %c0_i32, %c0_i32_0 : i32, i32
  }
  func.func @transform_6(%arg0: i32, %arg1: i32) -> (i32, i32) {
    %c0_i32 = arith.constant 0 : i32
    %c0_i32_0 = arith.constant 0 : i32
    %c0_i32_1 = arith.constant 0 : i32
    return %c0_i32, %c0_i32_0 : i32, i32
  }
  func.func @transform_7(%arg0: i32, %arg1: i32) -> (i32, i32, i32, i32) {
    %c0_i32 = arith.constant 0 : i32
    %c0_i32_0 = arith.constant 0 : i32
    %c0_i32_1 = arith.constant 0 : i32
    return %arg0, %arg1, %c0_i32, %c0_i32_0 : i32, i32, i32, i32
  }
}

</mosaic_0001>

<bundles_post_ra>
// kernel: boundary_enhance_forward.1
= control target key start
LH: loop header
LB: loop body
LE: loop exit
PB: predicated region body
PF: predicated region fallthrough
CT: control target
= control target key end

     0   :  { %s3487_s24 = smov 0   ;;  %s3489_s25 = smov 0   ;;  %s4564_s0 = inlined_call_operand.vmem [shape: f32[2,16,16,4], index: 0, kind: input, shape index: {}]   ;;  %s4565_s1 = inlined_call_operand.vmem [shape: f32[2,16,16,4], index: 1, kind: input, shape index: {}]   ;;  %s4566_s2 = inlined_call_operand.vmem [shape: f32[2,4,16,4], index: 2, kind: input, shape index: {}]   ;;  %s4567_s3 = inlined_call_operand.vmem [shape: f32[2,4,16,4], index: 3, kind: input, shape index: {}]   ;;  %s4568_s4 = inlined_call_operand.vmem [shape: f32[9,4,4], index: 4, kind: input, shape index: {}]   ;;  %s4569_s5 = inlined_call_operand.vmem [shape: f32[1,4], index: 5, kind: input, shape index: {}]   ;;  %s4570_s6 = inlined_call_operand.vmem [shape: f32[1,4], index: 6, kind: input, shape index: {}]   ;;  %s4571_s7 = inlined_call_operand.vmem [shape: f32[2,16,16,4], index: 7, kind: output, shape index: {}]  }
   0x1   :  { %s3491_s26 = smov 0   ;;  %s3493_s27 = smov 0  }
   0x2   :  { %s3495_s28 = smov 0  }
   0x3 LB: > { %s26_s29 = sadd.s32 1, %s3437_s26  ;;  %s29_s30 = sadd.s32 1, %s3441_s27  ;;  %s3445_s28 = sphi %s3495_s28, %s17_s28   ;;  %s3441_s27 = sphi %s3493_s27, %s4647_s27   ;;  %s3437_s26 = sphi %s3491_s26, %s4646_s26   ;;  %s3433_s25 = sphi %s3489_s25, %s4645_s25   ;;  %s3429_s24 = sphi %s3487_s24, %s4644_s24  }
   0x4   : > { %p27_p0 = scmp.ge.s32.totalorder %s26_s29, 2  ;;  %p2676_p1 = scmp.ge.s32.totalorder %s3445_s28, 1 }
   0x5   : > { %p313_p2 = scmp.lt.s32.totalorder %s3445_s28, 5 }
   0x6   : > { %s4649_s29 = smov (%p27_p0, %s26_s29), 0  ;;  %s4651_s30 = smov (!%p27_p0, %s29_s30), %s3441_s27 }
   0x7   : > { %p314_p3 = pnand %p2676_p1, %p313_p2  ;;  %p31_p4 = scmp.ge.s32.totalorder %s4651_s30, 2 }
   0x9   : > { %s4653_s30 = smov (%p31_p4, %s4651_s30), 0  ;;  %317 = sbr.rel (%p314_p3) target bundleno = 438 (0x1b6), region = 48 }
   0xe   : > { %v2717_v0 = vld [vmem:[%s4568_s4 + $0x4] sm:$0xf]  ;;  %vm804_vm0 = vcmask 1043456   ;;  %s2677_s10 = sshll.u32 %s3429_s24, 3  ;;  %p386_p5 = scmp.lt.s32.totalorder %s3433_s25, 1  ;;  %vm640_vm1 = vcmask 1040384  }
   0xf   : > { %3269 = vmatprep.subr.msk.mxu1 %vm804_vm0, %v2717_v0  ;;  %3035 = vmatprep.subr.msk.mxu0 %vm804_vm0, %v2717_v0  ;;  %p388_p6 = scmp.lt.s32.totalorder %s2677_s10, 15  ;;  %s2685_s11 = sshll.u32 %s3429_s24, 1  ;;  %v3529_v1 = vld [vmem:[%s4568_s4] sm:$0xf]  ;;  %v3536_v2 = vld [vmem:[%s4568_s4 + $0x8] sm:$0xf] }
  0x10   : > { %3270 = vmatpush3.msk.msra.mxu1 %vm804_vm0, %v2717_v0  ;;  %3036 = vmatpush3.msk.msra.mxu0 %vm804_vm0, %v2717_v0  ;;  %s4655_s25 = smov (!%p386_p5, %s3433_s25), 1  ;;  %p410_p7 = scmp.lt.s32.totalorder %s2685_s11, 3  ;;  %vm728_vm2 = vcmask 1046528   ;;  %vm771_vm3 = vcmask 31744   ;;  %vm1133_vm4 = vcmask 1045504  }
  0x11   : > { %s4657_s10 = smov (!%p388_p6, %s2677_s10), 15  ;;  %3061 = vmatprep.subr.msk.mxu1 %vm804_vm0, %v3529_v1  ;;  %3087 = vmatprep.subr.msk.mxu0 %vm804_vm0, %v3536_v2  ;;  %s2679_s16 = sshll.u32 %s4655_s25, 5 }
  0x12   : > { %s2678_s17 = sshll.u32 %s4657_s10, 1  ;;  %s2687_s23 = sshll.u32 %s4655_s25, 3 }
  0x13   : > { %s392_s18 = sadd.s32 %s2679_s16, %s2678_s17  ;;  %s4659_s11 = smov (!%p410_p7, %s2685_s11), 3 }
  0x14   : > { %s3542_s19 = sshll.u32 %s392_s18, 3  ;;  %s2686_s24 = sshll.u32 %s4659_s11, 1 }
  0x15   : > { %s3548_s22 = scalar_lea.vmem %s4564_s0, %s3542_s19  ;;  %s3554_s8 = sadd.s32 %s2687_s23, %s2686_s24 }
  0x16   : > { %v446_v3 = vld [vmem:[%s3548_s22 + $0x30] sm:$0xff]  ;;  %v447_v4 = vld [vmem:[%s3548_s22 + $0x38] sm:$0xff]  ;;  %v440_v7 = vld [vmem:[%s3548_s22] sm:$0xff]  ;;  %s2688_s25 = sshll.u32 %s3554_s8, 3  ;;  %s3581_s14 = scalar_lea.vmem %s4565_s1, %s3542_s19 }
  0x17   : > { %v2703_v5 = vmul.f32 -1.442695, %v446_v3  ;;  %v2704_v6 = vmul.f32 -1.442695, %v447_v4  ;;  %v441_v8 = vld [vmem:[%s3548_s22 + $0x8] sm:$0xff]  ;;  %v448_v11 = vld [vmem:[%s3548_s22 + $0x40] sm:$0xff]  ;;  %s3564_s11 = scalar_lea.vmem %s4566_s2, %s2688_s25  ;;  %s3594_s17 = scalar_lea.vmem %s4567_s3, %s2688_s25 }
  0x18   : > { %v2697_v9 = vmul.f32 -1.442695, %v440_v7  ;;  %v2698_v10 = vmul.f32 -1.442695, %v441_v8  ;;  %v449_v12 = vld [vmem:[%s3548_s22 + $0x48] sm:$0xff]  ;;  %v442_v15 = vld [vmem:[%s3548_s22 + $0x10] sm:$0xff]  ;;  %s4439_s21 = scalar_lea.vmem %s4571_s7, %s3542_s19 }
  0x19   : > { %3311 = vpow2.f32 %v2703_v5  ;;  %v2705_v13 = vmul.f32 -1.442695, %v448_v11  ;;  %v2706_v14 = vmul.f32 -1.442695, %v449_v12  ;;  %v472_v16 = vld [vmem:[%s3564_s11] sm:$0xff]  ;;  %v473_v17 = vld [vmem:[%s3564_s11 + $0x8] sm:$0xff] }
  0x1a   : > { %3313 = vpow2.f32 %v2704_v6  ;;  %v474_v18 = vld [vmem:[%s3564_s11 + $0x10] sm:$0xff]  ;;  %v2713_v19 = vmul.f32 -1.442695, %v472_v16  ;;  %v443_v20 = vld [vmem:[%s3548_s22 + $0x18] sm:$0xff]  ;;  %v2714_v21 = vmul.f32 -1.442695, %v473_v17 }
  0x1b   : > { %3315 = vpow2.f32 %v2697_v9  ;;  %v2715_v22 = vmul.f32 -1.442695, %v474_v18  ;;  %v2699_v23 = vmul.f32 -1.442695, %v442_v15  ;;  %v450_v24 = vld [vmem:[%s3548_s22 + $0x50] sm:$0xff]  ;;  %v451_v25 = vld [vmem:[%s3548_s22 + $0x58] sm:$0xff] }
  0x1c   : > { %3317 = vpow2.f32 %v2698_v10  ;;  %v2700_v26 = vmul.f32 -1.442695, %v443_v20  ;;  %v2707_v27 = vmul.f32 -1.442695, %v450_v24  ;;  %v444_v28 = vld [vmem:[%s3548_s22 + $0x20] sm:$0xff]  ;;  %v445_v29 = vld [vmem:[%s3548_s22 + $0x28] sm:$0xff] }
  0x1d   : > { %3319 = vpow2.f32 %v2705_v13  ;;  %v2708_v30 = vmul.f32 -1.442695, %v451_v25  ;;  %v2701_v31 = vmul.f32 -1.442695, %v444_v28  ;;  %v2702_v32 = vmul.f32 -1.442695, %v445_v29 }
  0x1e   : > { %3321 = vpow2.f32 %v2706_v14  ;;  %v475_v41 = vld [vmem:[%s3564_s11 + $0x18] sm:$0xff]  ;;  %v452_v45 = vld [vmem:[%s3548_s22 + $0x60] sm:$0xff]  ;;  %v453_v59 = vld [vmem:[%s3548_s22 + $0x68] sm:$0xff] }
  0x1f   : > { %3323 = vpow2.f32 %v2713_v19  ;;  %v2716_v49 = vmul.f32 -1.442695, %v475_v41  ;;  %v2709_v52 = vmul.f32 -1.442695, %v452_v45  ;;  %v454_v62 = vld [vmem:[%s3548_s22 + $0x70] sm:$0xff]  ;;  %v455_v4 = vld [vmem:[%s3548_s22 + $0x78] sm:$0xff] }
  0x20   : > { %3325 = vpow2.f32 %v2714_v21  ;;  %v462_v0 = vld [vmem:[%s3581_s14 + $0x30] sm:$0xff]  ;;  %v463_v6 = vld [vmem:[%s3581_s14 + $0x38] sm:$0xff]  ;;  %v2710_v8 = vmul.f32 -1.442695, %v453_v59  ;;  %v456_v10 = vld [vmem:[%s3581_s14] sm:$0xff] }
  0x21   : > { %3327 = vpow2.f32 %v2715_v22  ;;  %v2711_v12 = vmul.f32 -1.442695, %v454_v62  ;;  %v457_v15 = vld [vmem:[%s3581_s14 + $0x8] sm:$0xff]  ;;  %v2712_v16 = vmul.f32 -1.442695, %v455_v4  ;;  %v464_v19 = vld [vmem:[%s3581_s14 + $0x40] sm:$0xff] }
  0x22   : > { %3329 = vpow2.f32 %v2699_v23  ;;  %v476_v24 = vld [vmem:[%s3594_s17] sm:$0xff]  ;;  %v477_v29 = vld [vmem:[%s3594_s17 + $0x8] sm:$0xff] }
  0x23   : > { %3331 = vpow2.f32 %v2700_v26 }
  0x24   : > { %3333 = vpow2.f32 %v2707_v27 }
  0x25   : > { %3335 = vpow2.f32 %v2708_v30 }
  0x26   : > { %v3312_v33 = vpop.eup %3311  ;;  %3337 = vpow2.f32 %v2701_v31 }
  0x27   : > { %v3314_v34 = vpop.eup %3313  ;;  %v534_v35 = vadd.f32 1.0, %v3312_v33  ;;  %3339 = vpow2.f32 %v2702_v32  ;;  %v465_v32 = vld [vmem:[%s3581_s14 + $0x48] sm:$0xff] }
  0x28   : > { %v3316_v36 = vpop.eup %3315  ;;  %v535_v37 = vadd.f32 1.0, %v3314_v34 }
  0x29   : > { %v3318_v38 = vpop.eup %3317  ;;  %3341 = vrcp.f32 %v534_v35  ;;  %v528_v39 = vadd.f32 1.0, %v3316_v36 }
  0x2a   : > { %v3320_v40 = vpop.eup %3319  ;;  %3343 = vrcp.f32 %v535_v37  ;;  %v529_v42 = vadd.f32 1.0, %v3318_v38 }
  0x2b   : > { %v3322_v43 = vpop.eup %3321  ;;  %3345 = vrcp.f32 %v528_v39  ;;  %v536_v44 = vadd.f32 1.0, %v3320_v40 }
  0x2c   : > { %v3324_v46 = vpop.eup %3323  ;;  %3347 = vrcp.f32 %v529_v42  ;;  %v537_v47 = vadd.f32 1.0, %v3322_v43 }
  0x2d   : > { %v3326_v48 = vpop.eup %3325  ;;  %v604_v50 = vadd.f32 1.0, %v3324_v46  ;;  %3349 = vrcp.f32 %v536_v44 }
  0x2e   : > { %v605_v51 = vadd.f32 1.0, %v3326_v48  ;;  %3351 = vrcp.f32 %v537_v47  ;;  %v3328_v53 = vpop.eup %3327 }
  0x2f   : > { %3353 = vrcp.f32 %v604_v50  ;;  %v3330_v54 = vpop.eup %3329  ;;  %v606_v27 = vadd.f32 1.0, %v3328_v53 }
  0x30   : > { %3355 = vrcp.f32 %v605_v51  ;;  %v3332_v55 = vpop.eup %3331  ;;  %v530_v56 = vadd.f32 1.0, %v3330_v54 }
  0x31   : > { %3357 = vpow2.f32 %v2716_v49  ;;  %v3334_v57 = vpop.eup %3333  ;;  %v531_v58 = vadd.f32 1.0, %v3332_v55  ;;  %v458_v49 = vld [vmem:[%s3581_s14 + $0x10] sm:$0xff] }
  0x32   : > { %3359 = vpow2.f32 %v2709_v52  ;;  %v3336_v60 = vpop.eup %3335  ;;  %v538_v61 = vadd.f32 1.0, %v3334_v57 }
  0x33   : > { %3361 = vrcp.f32 %v530_v56  ;;  %v3338_v63 = vpop.eup %3337  ;;  %v539_v3 = vadd.f32 1.0, %v3336_v60  ;;  %v3640_v60 = vld [vmem:[%s4568_s4 + $0xc] sm:$0xf] }
  0x34   : > { %3363 = vrcp.f32 %v531_v58  ;;  %v3340_v5 = vpop.eup %3339  ;;  %v532_v7 = vadd.f32 1.0, %v3338_v63 }
  0x35   : > { %3365 = vrcp.f32 %v538_v61  ;;  %v533_v11 = vadd.f32 1.0, %v3340_v5 }
  0x36   : > { %v3342_v9 = vpop.eup %3341  ;;  %3367 = vrcp.f32 %v539_v3 }
  0x37   : > { %v3344_v13 = vpop.eup %3343  ;;  %v582_v14 = vmul.f32 %v3342_v9, %v462_v0  ;;  %3369 = vrcp.f32 %v532_v7 }
  0x38   : > { %v3346_v17 = vpop.eup %3345  ;;  %v583_v18 = vmul.f32 %v3344_v13, %v463_v6  ;;  %3371 = vrcp.f32 %v533_v11 }
  0x39   : > { %v3348_v20 = vpop.eup %3347  ;;  %v653_v21 = vrot.slane %v582_v14, 7  ;;  %v576_v22 = vmul.f32 %v3346_v17, %v456_v10  ;;  %3373 = vpow2.f32 %v2710_v8  ;;  %v459_v8 = vld [vmem:[%s3581_s14 + $0x18] sm:$0xff]  ;;  %v466_v14 = vld [vmem:[%s3581_s14 + $0x50] sm:$0xff] }
  0x3a   : > { %v3350_v23 = vpop.eup %3349  ;;  %v654_v25 = vrot.slane %v583_v18, 7  ;;  %v577_v26 = vmul.f32 %v3348_v20, %v457_v15  ;;  %3375 = vpow2.f32 %v2711_v12  ;;  %v467_v15 = vld [vmem:[%s3581_s14 + $0x58] sm:$0xff]  ;;  %v460_v20 = vld [vmem:[%s3581_s14 + $0x20] sm:$0xff] }
  0x3b   : > { %v3352_v28 = vpop.eup %3351  ;;  %v3601_v30 = vsel %vm640_vm1, 0.0, %v653_v21  ;;  %v644_v31 = vrot.slane %v576_v22, 7  ;;  %v584_v33 = vmul.f32 %v3350_v23, %v464_v19  ;;  %3377 = vpow2.f32 %v2712_v16 }
  0x3c   : > { %v3354_v34 = vpop.eup %3353  ;;  %v3605_v35 = vsel %vm640_vm1, %v653_v21, %v654_v25  ;;  %v749_v36 = vrot.slane %v3601_v30, 1  ;;  %v3609_v37 = vsel %vm640_vm1, %v654_v25, 0.0  ;;  %v645_v38 = vrot.slane %v577_v26, 7  ;;  %v461_v21 = vld [vmem:[%s3581_s14 + $0x28] sm:$0xff] }
  0x3d   : > { %v3356_v39 = vpop.eup %3355  ;;  %v616_v40 = vmul.f32 %v3354_v34, %v476_v24  ;;  %v750_v41 = vrot.slane %v3605_v35, 1  ;;  %v752_v42 = vrot.slane %v3609_v37, 1  ;;  %v3614_v43 = vsel %vm640_vm1, 0.0, %v644_v31 }
  0x3e   : > { %v3616_v44 = vpop.eup %3357  ;;  %v617_v45 = vmul.f32 %v3356_v39, %v477_v29  ;;  %v3619_v46 = vsel %vm640_vm1, %v644_v31, %v645_v38  ;;  %v734_v47 = vrot.slane %v3614_v43, 1  ;;  %v585_v48 = vmul.f32 %v3352_v28, %v465_v32 }
  0x3f   : > { %v3623_v50 = vpop.eup %3359  ;;  %v641_v51 = vrot.slane %v616_v40, 7  ;;  %v3626_v52 = vsel %vm728_vm2, %v749_v36, %v750_v41  ;;  %v3629_v53 = vsel %vm728_vm2, %v750_v41, %v752_v42  ;;  %v735_v54 = vrot.slane %v3619_v46, 1 }
  0x40   : > { %v3362_v55 = vpop.eup %3361  ;;  %v642_v56 = vrot.slane %v617_v45, 7  ;;  %3049 = vmatprep.mubr.msk.f32.mxu1 %vm771_vm3, %v3626_v52  ;;  %v656_v57 = vrot.slane %v584_v33, 7  ;;  %v657_v58 = vrot.slane %v585_v48, 7  ;;  %v3635_v59 = vsel %vm640_vm1, %v645_v38, 0.0  ;;  %v3693_v33 = vld [vmem:[%s4568_s4 + $0x10] sm:$0xf] }
  0x41   : > { %v3364_v61 = vpop.eup %3363  ;;  %v3643_v62 = vsel %vm640_vm1, 0.0, %v641_v51  ;;  %3050 = vmatmul.mubr.msk.f32.vlgmr.msra.gmra.mxu1 %vm771_vm3, %v3629_v53  ;;  %v737_v63 = vrot.slane %v3635_v59, 1  ;;  %v578_v0 = vmul.f32 %v3362_v55, %v458_v49  ;;  %3379 = vrcp.f32 %v606_v27 }
  0x42   : > { %v3366_v3 = vpop.eup %3365  ;;  %v3649_v4 = vsel %vm640_vm1, %v641_v51, %v642_v56  ;;  %v729_v5 = vrot.slane %v3643_v62, 1  ;;  %v3653_v6 = vsel %vm640_vm1, %v642_v56, 0.0  ;;  %3062 = vmatpush3.msk.msra.mxu1 %vm804_vm0, %v3529_v1  ;;  %v3658_v7 = vsel %vm640_vm1, %v656_v57, %v657_v58 }
  0x43   : > { %v3368_v9 = vpop.eup %3367  ;;  %v730_v10 = vrot.slane %v3649_v4, 1  ;;  %v732_v11 = vrot.slane %v3653_v6, 1  ;;  %v3664_v12 = vsel %vm728_vm2, %v734_v47, %v735_v54  ;;  %v3667_v13 = vsel %vm640_vm1, 0.0, %v656_v57  ;;  %3113 = vmatprep.subr.msk.mxu1 %vm804_vm0, %v3640_v60 }
  0x44   : > { %v3370_v1 = vpop.eup %3369  ;;  %v754_v16 = vrot.slane %v3667_v13, 1  ;;  %v755_v17 = vrot.slane %v3658_v7, 1  ;;  %v3676_v18 = vsel %vm728_vm2, %v735_v54, %v737_v63  ;;  %v3679_v19 = vsel %vm640_vm1, %v657_v58, 0.0 }
  0x45   : > { %v3372_v22 = vpop.eup %3371  ;;  %v731_v23 = vsel %vm728_vm2, %v729_v5, %v730_v10  ;;  %v733_v24 = vsel %vm728_vm2, %v730_v10, %v732_v11  ;;  %v757_v25 = vrot.slane %v3679_v19, 1  ;;  %v579_v26 = vmul.f32 %v3364_v61, %v459_v8 }
  0x46   : > { %v3374_v27 = vpop.eup %3373  ;;  %3037 = vmatprep.mubr.msk.f32.mxu0 %vm771_vm3, %v731_v23  ;;  %v3688_v28 = vsel %vm728_vm2, %v754_v16, %v755_v17  ;;  %v647_v29 = vrot.slane %v578_v0, 7  ;;  %v586_v31 = vmul.f32 %v3366_v3, %v466_v14  ;;  %v587_v32 = vmul.f32 %v3368_v9, %v467_v15 }
  0x47   : > { %v3695_v34 = vpop.eup %3375  ;;  %3038 = vmatmul.mubr.msk.f32.vlgmr.msra.gmra.mxu0 %vm771_vm3, %v733_v24  ;;  %3052 = vmatprep.mubr.msk.f32.mxu1 %vm771_vm3, %v3688_v28  ;;  %v3701_v36 = vsel %vm728_vm2, %v755_v17, %v757_v25  ;;  %v648_v38 = vrot.slane %v579_v26, 7  ;;  %v580_v39 = vmul.f32 %v3370_v1, %v460_v20  ;;  %v581_v40 = vmul.f32 %v3372_v22, %v461_v21 }
  0x48   : > { %v3703_v41 = vpop.eup %3377  ;;  %3088 = vmatpush3.msk.msra.mxu0 %vm804_vm0, %v3536_v2  ;;  %3040 = vmatprep.mubr.msk.f32.mxu0 %vm771_vm3, %v3664_v12  ;;  %v3710_v42 = vsel %vm640_vm1, 0.0, %v647_v29  ;;  %v659_v45 = vrot.slane %v586_v31, 7  ;;  %v660_v47 = vrot.slane %v587_v32, 7  ;;  %v540_v48 = vadd.f32 1.0, %v3623_v50 }
  0x49   : > { %3053 = vmatmul.mubr.msk.f32.gmra.mxu1 %vm771_vm3, %v3701_v36  ;;  %v3716_v49 = vsel %vm640_vm1, %v647_v29, %v648_v38  ;;  %v739_v51 = vrot.slane %v3710_v42, 1  ;;  %v3720_v2 = vsel %vm640_vm1, %v648_v38, 0.0  ;;  %v650_v54 = vrot.slane %v580_v39, 7  ;;  %3139 = vmatprep.subr.msk.mxu0 %vm804_vm0, %v3693_v33 }
  0x4a   : > { %v740_v55 = vrot.slane %v3716_v49, 1  ;;  %v3726_v56 = vsel %vm640_vm1, %v659_v45, %v660_v47  ;;  %v3729_v50 = vsel %vm640_vm1, 0.0, %v659_v45  ;;  %v742_v57 = vrot.slane %v3720_v2, 1 }
  0x4b   : > { %3041 = vmatmul.mubr.msk.f32.gmra.mxu0 %vm771_vm3, %v3676_v18  ;;  %v759_v58 = vrot.slane %v3729_v50, 1  ;;  %v760_v61 = vrot.slane %v3726_v56, 1  ;;  %v3737_v63 = vsel %vm640_vm1, %v660_v47, 0.0  ;;  %v651_v0 = vrot.slane %v581_v40, 7  ;;  %v478_v47 = vld [vmem:[%s3594_s17 + $0x10] sm:$0xff] }
  0x4c   : > { %v3740_v3 = vsel %vm728_vm2, %v739_v51, %v740_v55  ;;  %v3743_v5 = vsel %vm728_vm2, %v740_v55, %v742_v57  ;;  %v762_v8 = vrot.slane %v3737_v63, 1  ;;  %v3747_v9 = vsel %vm640_vm1, 0.0, %v650_v54  ;;  %v468_v57 = vld [vmem:[%s3581_s14 + $0x60] sm:$0xff] }
  0x4d   : > { %3043 = vmatprep.mubr.msk.f32.mxu0 %vm771_vm3, %v3740_v3  ;;  %v3752_v10 = vsel %vm728_vm2, %v759_v58, %v760_v61  ;;  %v3755_v11 = vsel %vm640_vm1, %v650_v54, %v651_v0  ;;  %v744_v14 = vrot.slane %v3747_v9, 1  ;;  %v541_v15 = vadd.f32 1.0, %v3374_v27 }
  0x4e   : > { %v3380_v1 = vpop.eup %3379  ;;  %3055 = vmatprep.mubr.msk.f32.mxu1 %vm771_vm3, %v3752_v10  ;;  %v3761_v16 = vsel %vm728_vm2, %v760_v61, %v762_v8  ;;  %v745_v17 = vrot.slane %v3755_v11, 1  ;;  %3381 = vrcp.f32 %v540_v48  ;;  %v704_v20 = vsel %vm640_vm1, %v651_v0, 0.0  ;;  %v3798_v48 = vld [vmem:[%s4568_s4 + $0x18] sm:$0xf] }
  0x4f   : > { %3044 = vmatmul.mubr.msk.f32.gmra.mxu0 %vm771_vm3, %v3743_v5  ;;  %3056 = vmatmul.mubr.msk.f32.gmra.mxu1 %vm771_vm3, %v3761_v16  ;;  %3383 = vrcp.f32 %v541_v15  ;;  %v747_v21 = vrot.slane %v704_v20, 1  ;;  %v1134_v22 = vrot.slane %v3643_v62, 2  ;;  %v1135_v23 = vrot.slane %v3649_v4, 2 }
  0x50   : > { %v1137_v24 = vrot.slane %v3653_v6, 2  ;;  %v3773_v25 = vsel %vm728_vm2, %v744_v14, %v745_v17  ;;  %v1139_v29 = vrot.slane %v3614_v43, 2  ;;  %v1140_v31 = vrot.slane %v3619_v46, 2 }
  0x51   : > { %3046 = vmatprep.mubr.msk.f32.mxu0 %vm771_vm3, %v3773_v25  ;;  %v3778_v26 = vsel %vm728_vm2, %v745_v17, %v747_v21  ;;  %v1136_v27 = vsel %vm1133_vm4, %v1134_v22, %v1135_v23  ;;  %v1142_v6 = vrot.slane %v3635_v59, 2  ;;  %v607_v38 = vadd.f32 1.0, %v3616_v44 }
  0x52   : > { %v1138_v32 = vsel %vm1133_vm4, %v1135_v23, %v1137_v24  ;;  %v3790_v39 = vsel %vm1133_vm4, %v1139_v29, %v1140_v31  ;;  %v1144_v40 = vrot.slane %v3710_v42, 2  ;;  %v1145_v45 = vrot.slane %v3716_v49, 2 }
  0x53   : > { %3047 = vmatmul.mubr.msk.f32.gmra.mxu0 %vm771_vm3, %v3778_v26  ;;  %v3802_v59 = vsel %vm1133_vm4, %v1140_v31, %v1142_v6  ;;  %v542_v44 = vadd.f32 1.0, %v3695_v34  ;;  %v1147_v51 = vrot.slane %v3720_v2, 2  ;;  %v543_v54 = vadd.f32 1.0, %v3703_v41 }
  0x54   : > { %3089 = vmatprep.mubr.msk.f32.mxu0 %vm771_vm3, %v1136_v27  ;;  %v3811_v55 = vmul.f32 %v3380_v1, %v478_v47  ;;  %3385 = vrcp.f32 %v607_v38  ;;  %v3815_v58 = vsel %vm1133_vm4, %v1144_v40, %v1145_v45  ;;  %v1149_v61 = vrot.slane %v3747_v9, 2 }
  0x55   : > { %v1150_v34 = vrot.slane %v3755_v11, 2  ;;  %3387 = vrcp.f32 %v542_v44  ;;  %v3828_v14 = vsel %vm1133_vm4, %v1145_v45, %v1147_v51  ;;  %v1152_v15 = vrot.slane %v704_v20, 2 }
  0x56   : > { %3389 = vrcp.f32 %v543_v54  ;;  %v668_v2 = vrot.slane %v3811_v55, 7  ;;  %v1154_v22 = vrot.slane %v3601_v30, 2  ;;  %v1155_v23 = vrot.slane %v3605_v35, 2 }
  0x57   : > { %3090 = vmatmul.mubr.msk.f32.vlgmr.msra.gmra.mxu0 %vm771_vm3, %v1138_v32  ;;  %v3836_v21 = vsel %vm1133_vm4, %v1149_v61, %v1150_v34  ;;  %v1157_v20 = vrot.slane %v3609_v37, 2  ;;  %v3849_v31 = vsel %vm1133_vm4, %v1150_v34, %v1152_v15  ;;  %v1159_v6 = vrot.slane %v3667_v13, 2  ;;  %v479_v61 = vld [vmem:[%s3594_s17 + $0x18] sm:$0xff] }
  0x58   : > { %3140 = vmatpush3.msk.msra.mxu0 %vm804_vm0, %v3693_v33  ;;  %3092 = vmatprep.mubr.msk.f32.mxu0 %vm771_vm3, %v3790_v39  ;;  %v469_v33 = vld [vmem:[%s3581_s14 + $0x68] sm:$0xff]  ;;  %v3833_v1 = vsel %vm640_vm1, 0.0, %v668_v2  ;;  %v1160_v32 = vrot.slane %v3658_v7, 2  ;;  %v3861_v45 = vsel %vm1133_vm4, %v1154_v22, %v1155_v23  ;;  %v1162_v54 = vrot.slane %v3679_v19, 2 }
  0x59   : > { %3191 = vmatprep.subr.msk.mxu0 %vm804_vm0, %v3798_v48  ;;  %v3868_v51 = vsel %vm1133_vm4, %v1155_v23, %v1157_v20 }
  0x5a   : > { %4580 = vst [vmem:[#allocation2_spill] sm:$0xff] %v3868_v51  ;;  %v3887_v19 = vsel %vm1133_vm4, %v1159_v6, %v1160_v32 }
  0x5b   : > { %v3382_v41 = vpop.eup %3381  ;;  %3093 = vmatmul.mubr.msk.f32.gmra.mxu0 %vm771_vm3, %v3802_v59  ;;  %4581 = vst [vmem:[#allocation3_spill] sm:$0xff] %v3887_v19 }
  0x5c   : > { %v3384_v0 = vpop.eup %3383  ;;  %v588_v8 = vmul.f32 %v3382_v41, %v468_v57  ;;  %3095 = vmatprep.mubr.msk.f32.mxu0 %vm771_vm3, %v3815_v58  ;;  %v1164_v57 = vrot.slane %v3729_v50, 2  ;;  %v1165_v41 = vrot.slane %v3726_v56, 2 }
  0x5d   : > { %v589_v17 = vmul.f32 %v3384_v0, %v469_v33  ;;  %v1167_v0 = vrot.slane %v3737_v63, 2  ;;  %v3899_v63 = vsel %vm1133_vm4, %v1160_v32, %v1162_v54  ;;  %v2066_v54 = vrot.slane %v3833_v1, 1 }
  0x5e   : > { %v662_v24 = vrot.slane %v588_v8, 7  ;;  %v470_v8 = vld [vmem:[%s3581_s14 + $0x70] sm:$0xff]  ;;  %4582 = vst [vmem:[#allocation4_spill] sm:$0xff] %v3899_v63 }
  0x5f   : > { %v663_v27 = vrot.slane %v589_v17, 7  ;;  %3096 = vmatmul.mubr.msk.f32.gmra.mxu0 %vm771_vm3, %v3828_v14  ;;  %v471_v17 = vld [vmem:[%s3581_s14 + $0x78] sm:$0xff] }
  0x60   : > { %v3844_v29 = vsel %vm640_vm1, 0.0, %v662_v24  ;;  %3098 = vmatprep.mubr.msk.f32.mxu0 %vm771_vm3, %v3836_v21 }
  0x61   : > { %v3854_v38 = vsel %vm640_vm1, %v662_v24, %v663_v27  ;;  %v764_v37 = vrot.slane %v3844_v29, 1  ;;  %v3858_v40 = vsel %vm640_vm1, %v663_v27, 0.0  ;;  %v3386_v15 = vpop.eup %3385  ;;  %v1169_v23 = vrot.slane %v3844_v29, 2 }
  0x62   : > { %v765_v47 = vrot.slane %v3854_v38, 1  ;;  %v767_v44 = vrot.slane %v3858_v40, 1  ;;  %v3388_v22 = vpop.eup %3387  ;;  %v1170_v24 = vrot.slane %v3854_v38, 2  ;;  %v619_v27 = vmul.f32 %v3386_v15, %v479_v61  ;;  %v3913_v15 = vld [vmem:[%s4568_s4 + $0x14] sm:$0xf] }
  0x63   : > { %3099 = vmatmul.mubr.msk.f32.gmra.mxu0 %vm771_vm3, %v3849_v31  ;;  %v3390_v20 = vpop.eup %3389  ;;  %v590_v6 = vmul.f32 %v3388_v22, %v470_v8  ;;  %v2241_v8 = vrot.slane %v3833_v1, 2 }
  0x64   : > { %v3874_v34 = vsel %vm728_vm2, %v764_v37, %v765_v47  ;;  %v3877_v33 = vsel %vm728_vm2, %v765_v47, %v767_v44  ;;  %3101 = vmatprep.mubr.msk.f32.mxu0 %vm771_vm3, %v3861_v45  ;;  %v3904_v37 = vsel %vm1133_vm4, %v1164_v57, %v1165_v41  ;;  %v3907_v47 = vsel %vm1133_vm4, %v1165_v41, %v1167_v0 }
  0x65   : > { %3058 = vmatprep.mubr.msk.f32.mxu1 %vm771_vm3, %v3874_v34  ;;  %4583 = vst [vmem:[#allocation5_spill] sm:$0xff] %v3904_v37  ;;  %v591_v44 = vmul.f32 %v3390_v20, %v471_v17  ;;  %v669_v61 = vrot.slane %v619_v27, 7  ;;  %v665_v32 = vrot.slane %v590_v6, 7  ;;  %v3920_v57 = vsel %vm1133_vm4, %v1169_v23, %v1170_v24 }
  0x66   : > { %3059 = vmatmul.mubr.msk.f32.gmra.mxu1 %vm771_vm3, %v3877_v33 }
  0x67   : > { %3063 = vmatprep.mubr.msk.f32.mxu1 %vm771_vm3, %v3643_v62  ;;  %3102 = vmatmul.mubr.msk.f32.gmra.mxu0 %vm771_vm3, %v3868_v51  ;;  %v1172_v62 = vrot.slane %v3858_v40, 2  ;;  %v666_v41 = vrot.slane %v591_v44, 7  ;;  %v3925_v40 = vsel %vm640_vm1, %v668_v2, %v669_v61  ;;  %v710_v0 = vsel %vm640_vm1, %v669_v61, 0.0 }
  0x68   : > { %3104 = vmatprep.mubr.msk.f32.mxu0 %vm771_vm3, %v3887_v19  ;;  %v3933_v17 = vsel %vm640_vm1, 0.0, %v665_v32  ;;  %v2242_v22 = vrot.slane %v3925_v40, 2  ;;  %v2069_v23 = vrot.slane %v710_v0, 1  ;;  %v2244_v19 = vrot.slane %v710_v0, 2 }
  0x69   : > { %v3942_v55 = vsel %vm640_vm1, %v665_v32, %v666_v41  ;;  %v1719_v2 = vrot.slane %v3933_v17, 2  ;;  %v709_v27 = vsel %vm640_vm1, %v666_v41, 0.0  ;;  %v3984_v0 = vsel %vm1133_vm4, %v1170_v24, %v1172_v62 }
  0x6a   : > { %3064 = vmatmul.mubr.msk.f32.vlgmr.msra.gmra.mxu1 %vm771_vm3, %v3649_v4  ;;  %v2067_v4 = vrot.slane %v3925_v40, 1  ;;  %v1545_v20 = vrot.slane %v3942_v55, 1  ;;  %v1547_v6 = vrot.slane %v709_v27, 1  ;;  %v1720_v44 = vrot.slane %v3942_v55, 2 }
  0x6b   : > { %3114 = vmatpush3.msk.msra.mxu1 %vm804_vm0, %v3640_v60  ;;  %3066 = vmatprep.mubr.msk.f32.mxu1 %vm771_vm3, %v3614_v43  ;;  %v1544_v60 = vrot.slane %v3933_v17, 1  ;;  %v1722_v61 = vrot.slane %v709_v27, 2 }
  0x6c   : > { %3105 = vmatmul.mubr.msk.f32.gmra.mxu0 %vm771_vm3, %v3899_v63  ;;  %3165 = vmatprep.subr.msk.mxu1 %vm804_vm0, %v3913_v15  ;;  %v3954_v32 = vsel %vm728_vm2, %v2066_v54, %v2067_v4  ;;  %v3957_v63 = vsel %vm1133_vm4, %v2241_v8, %v2242_v22  ;;  %v3960_v41 = vsel %vm728_vm2, %v2067_v4, %v2069_v23 }
  0x6d   : > { %3107 = vmatprep.mubr.msk.f32.mxu0 %vm771_vm3, %v3904_v37  ;;  %v3965_v37 = vsel %vm728_vm2, %v1544_v60, %v1545_v20  ;;  %v3968_v27 = vsel %vm728_vm2, %v1545_v20, %v1547_v6  ;;  %v3971_v51 = vsel %vm1133_vm4, %v1719_v2, %v1720_v44  ;;  %v3974_v54 = vsel %vm1133_vm4, %v1720_v44, %v1722_v61 }
  0x6e   : > { %3067 = vmatmul.mubr.msk.f32.gmra.mxu1 %vm771_vm3, %v3619_v46  ;;  %v3979_v8 = vsel %vm1133_vm4, %v2242_v22, %v2244_v19  ;;  %v2860_v19 = vld [vmem:[%s4568_s4 + $0x20] sm:$0xf] }
  0x6f   : > { %3069 = vmatprep.mubr.msk.f32.mxu1 %vm771_vm3, %v3710_v42 }
  0x70   : > { %3108 = vmatmul.mubr.msk.f32.gmra.mxu0 %vm771_vm3, %v3907_v47 }
  0x71   : > { %3110 = vmatprep.mubr.msk.f32.mxu0 %vm771_vm3, %v3920_v57 }
  0x72   : > { %3070 = vmatmul.mubr.msk.f32.gmra.mxu1 %vm771_vm3, %v3716_v49 }
  0x73   : > { %3072 = vmatprep.mubr.msk.f32.mxu1 %vm771_vm3, %v3747_v9 }
  0x74   : > { %3111 = vmatmul.mubr.msk.f32.gmra.mxu0 %vm771_vm3, %v3984_v0 }
  0x75   : > { %3141 = vmatprep.mubr.msk.f32.mxu0 %vm771_vm3, %v3664_v12  ;;  %v2842_v12 = vld [vmem:[%s4568_s4 + $0x1c] sm:$0xf] }
  0x76   : > { %3073 = vmatmul.mubr.msk.f32.gmra.mxu1 %vm771_vm3, %v3755_v11 }
  0x77   : > { %3075 = vmatprep.mubr.msk.f32.mxu1 %vm771_vm3, %v3601_v30 }
  0x78   : > { %3142 = vmatmul.mubr.msk.f32.vlgmr.msra.gmra.mxu0 %vm771_vm3, %v3676_v18 }
  0x79   : > { %3192 = vmatpush3.msk.msra.mxu0 %vm804_vm0, %v3798_v48  ;;  %3144 = vmatprep.mubr.msk.f32.mxu0 %vm771_vm3, %v3740_v3 }
  0x7a   : > { %3076 = vmatmul.mubr.msk.f32.gmra.mxu1 %vm771_vm3, %v3605_v35  ;;  %3243 = vmatprep.subr.msk.mxu0 %vm804_vm0, %v2860_v19 }
  0x7b   : > { %3078 = vmatprep.mubr.msk.f32.mxu1 %vm771_vm3, %v3667_v13 }
  0x7c   : > { %3145 = vmatmul.mubr.msk.f32.gmra.mxu0 %vm771_vm3, %v3743_v5 }
  0x7d   : > { %3147 = vmatprep.mubr.msk.f32.mxu0 %vm771_vm3, %v3773_v25 }
  0x7e   : > { %3079 = vmatmul.mubr.msk.f32.gmra.mxu1 %vm771_vm3, %v3658_v7 }
  0x7f   : > { %3081 = vmatprep.mubr.msk.f32.mxu1 %vm771_vm3, %v3729_v50 }
  0x80   : > { %3148 = vmatmul.mubr.msk.f32.gmra.mxu0 %vm771_vm3, %v3778_v26 }
  0x81   : > { %3150 = vmatprep.mubr.msk.f32.mxu0 %vm771_vm3, %v3626_v52 }
  0x82   : > { %3082 = vmatmul.mubr.msk.f32.gmra.mxu1 %vm771_vm3, %v3726_v56 }
  0x83   : > { %3084 = vmatprep.mubr.msk.f32.mxu1 %vm771_vm3, %v3844_v29 }
  0x84   : > { %3151 = vmatmul.mubr.msk.f32.gmra.mxu0 %vm771_vm3, %v3629_v53 }
  0x85   : > { %3153 = vmatprep.mubr.msk.f32.mxu0 %vm771_vm3, %v3688_v28 }
  0x86   : > { %3085 = vmatmul.mubr.msk.f32.gmra.mxu1 %vm771_vm3, %v3854_v38 }
  0x87   : > { %3115 = vmatprep.mubr.msk.f32.mxu1 %vm771_vm3, %v3614_v43  ;;  %v4586_v43 = vld [vmem:[#allocation4_spill] sm:$0xff] }
  0x88   : > { %3154 = vmatmul.mubr.msk.f32.gmra.mxu0 %vm771_vm3, %v3701_v36 }
  0x89   : > { %3156 = vmatprep.mubr.msk.f32.mxu0 %vm771_vm3, %v3752_v10 }
  0x8a   : > { %3116 = vmatmul.mubr.msk.f32.vlgmr.msra.gmra.mxu1 %vm771_vm3, %v3619_v46  ;;  %v4587_v46 = vld [vmem:[#allocation5_spill] sm:$0xff] }
  0x8b   : > { %3166 = vmatpush3.msk.msra.mxu1 %vm804_vm0, %v3913_v15  ;;  %3118 = vmatprep.mubr.msk.f32.mxu1 %vm771_vm3, %v3710_v42 }
  0x8c   : > { %3157 = vmatmul.mubr.msk.f32.gmra.mxu0 %vm771_vm3, %v3761_v16  ;;  %3217 = vmatprep.subr.msk.mxu1 %vm804_vm0, %v2842_v12 }
  0x8d   : > { %3159 = vmatprep.mubr.msk.f32.mxu0 %vm771_vm3, %v3874_v34 }
  0x8e   : > { %3119 = vmatmul.mubr.msk.f32.gmra.mxu1 %vm771_vm3, %v3716_v49 }
  0x8f   : > { %3121 = vmatprep.mubr.msk.f32.mxu1 %vm771_vm3, %v3747_v9 }
  0x90   : > { %3160 = vmatmul.mubr.msk.f32.gmra.mxu0 %vm771_vm3, %v3877_v33 }
  0x91   : > { %3162 = vmatprep.mubr.msk.f32.mxu0 %vm771_vm3, %v3965_v37 }
  0x92   : > { %3122 = vmatmul.mubr.msk.f32.gmra.mxu1 %vm771_vm3, %v3755_v11 }
  0x93   : > { %3124 = vmatprep.mubr.msk.f32.mxu1 %vm771_vm3, %v3601_v30 }
  0x94   : > { %3163 = vmatmul.mubr.msk.f32.gmra.mxu0 %vm771_vm3, %v3968_v27 }
  0x95   : > { %3193 = vmatprep.mubr.msk.f32.mxu0 %vm771_vm3, %v3710_v42 }
  0x96   : > { %3125 = vmatmul.mubr.msk.f32.gmra.mxu1 %vm771_vm3, %v3605_v35 }
  0x97   : > { %3127 = vmatprep.mubr.msk.f32.mxu1 %vm771_vm3, %v3667_v13 }
  0x98   : > { %3194 = vmatmul.mubr.msk.f32.vlgmr.msra.gmra.mxu0 %vm771_vm3, %v3716_v49 }
  0x99   : > { %3244 = vmatpush3.msk.msra.mxu0 %vm804_vm0, %v2860_v19  ;;  %3196 = vmatprep.mubr.msk.f32.mxu0 %vm771_vm3, %v3747_v9 }
  0x9a   : > { %3128 = vmatmul.mubr.msk.f32.gmra.mxu1 %vm771_vm3, %v3658_v7 }
  0x9b   : > { %3130 = vmatprep.mubr.msk.f32.mxu1 %vm771_vm3, %v3729_v50 }
  0x9c   : > { %3197 = vmatmul.mubr.msk.f32.gmra.mxu0 %vm771_vm3, %v3755_v11 }
  0x9d   : > { %3199 = vmatprep.mubr.msk.f32.mxu0 %vm771_vm3, %v3601_v30  ;;  %v4584_v30 = vld [vmem:[#allocation2_spill] sm:$0xff] }
  0x9e   : > { %3131 = vmatmul.mubr.msk.f32.gmra.mxu1 %vm771_vm3, %v3726_v56 }
  0x9f   : > { %3133 = vmatprep.mubr.msk.f32.mxu1 %vm771_vm3, %v3844_v29 }
  0xa0   : > { %3200 = vmatmul.mubr.msk.f32.gmra.mxu0 %vm771_vm3, %v3605_v35  ;;  %v4585_v35 = vld [vmem:[#allocation3_spill] sm:$0xff] }
  0xa1   : > { %3202 = vmatprep.mubr.msk.f32.mxu0 %vm771_vm3, %v3667_v13 }
  0xa2   : > { %3134 = vmatmul.mubr.msk.f32.gmra.mxu1 %vm771_vm3, %v3854_v38 }
  0xa3   : > { %3136 = vmatprep.mubr.msk.f32.mxu1 %vm771_vm3, %v3933_v17 }
  0xa4   : > { %3203 = vmatmul.mubr.msk.f32.gmra.mxu0 %vm771_vm3, %v3658_v7 }
  0xa5   : > { %3205 = vmatprep.mubr.msk.f32.mxu0 %vm771_vm3, %v3729_v50 }
  0xa6   : > { %3137 = vmatmul.mubr.msk.f32.gmra.mxu1 %vm771_vm3, %v3942_v55 }
  0xa7   : > { %3167 = vmatprep.mubr.msk.f32.mxu1 %vm771_vm3, %v3790_v39 }
  0xa8   : > { %3206 = vmatmul.mubr.msk.f32.gmra.mxu0 %vm771_vm3, %v3726_v56 }
  0xa9   : > { %3208 = vmatprep.mubr.msk.f32.mxu0 %vm771_vm3, %v3844_v29 }
  0xaa   : > { %3168 = vmatmul.mubr.msk.f32.vlgmr.msra.gmra.mxu1 %vm771_vm3, %v3802_v59 }
  0xab   : > { %3218 = vmatpush3.msk.msra.mxu1 %vm804_vm0, %v2842_v12  ;;  %3170 = vmatprep.mubr.msk.f32.mxu1 %vm771_vm3, %v3815_v58 }
  0xac   : > { %3209 = vmatmul.mubr.msk.f32.gmra.mxu0 %vm771_vm3, %v3854_v38 }
  0xad   : > { %3211 = vmatprep.mubr.msk.f32.mxu0 %vm771_vm3, %v3933_v17 }
  0xae   : > { %3171 = vmatmul.mubr.msk.f32.gmra.mxu1 %vm771_vm3, %v3828_v14 }
  0xaf   : > { %3173 = vmatprep.mubr.msk.f32.mxu1 %vm771_vm3, %v3836_v21 }
  0xb0   : > { %3212 = vmatmul.mubr.msk.f32.gmra.mxu0 %vm771_vm3, %v3942_v55 }
  0xb1   : > { %3214 = vmatprep.mubr.msk.f32.mxu0 %vm771_vm3, %v3833_v1 }
  0xb2   : > { %3174 = vmatmul.mubr.msk.f32.gmra.mxu1 %vm771_vm3, %v3849_v31 }
  0xb3   : > { %3176 = vmatprep.mubr.msk.f32.mxu1 %vm771_vm3, %v3861_v45 }
  0xb4   : > { %3215 = vmatmul.mubr.msk.f32.gmra.mxu0 %vm771_vm3, %v3925_v40 }
  0xb5   : > { %3245 = vmatprep.mubr.msk.f32.mxu0 %vm771_vm3, %v3815_v58 }
  0xb6   : > { %3177 = vmatmul.mubr.msk.f32.gmra.mxu1 %vm771_vm3, %v4584_v30 }
  0xb7   : > { %3179 = vmatprep.mubr.msk.f32.mxu1 %vm771_vm3, %v4585_v35 }
  0xb8   : > { %3246 = vmatmul.mubr.msk.f32.vlgmr.msra.gmra.mxu0 %vm771_vm3, %v3828_v14 }
  0xb9   : > { %3248 = vmatprep.mubr.msk.f32.mxu0 %vm771_vm3, %v3836_v21 }
  0xba   : > { %3180 = vmatmul.mubr.msk.f32.gmra.mxu1 %vm771_vm3, %v4586_v43 }
  0xbb   : > { %3182 = vmatprep.mubr.msk.f32.mxu1 %vm771_vm3, %v4587_v46 }
  0xbc   : > { %3249 = vmatmul.mubr.msk.f32.gmra.mxu0 %vm771_vm3, %v3849_v31 }
  0xbd   : > { %3251 = vmatprep.mubr.msk.f32.mxu0 %vm771_vm3, %v3861_v45 }
  0xbe   : > { %3183 = vmatmul.mubr.msk.f32.gmra.mxu1 %vm771_vm3, %v3907_v47 }
  0xbf   : > { %3185 = vmatprep.mubr.msk.f32.mxu1 %vm771_vm3, %v3920_v57 }
  0xc0   : > { %3252 = vmatmul.mubr.msk.f32.gmra.mxu0 %vm771_vm3, %v4584_v30 }
  0xc1   : > { %3254 = vmatprep.mubr.msk.f32.mxu0 %vm771_vm3, %v4585_v35 }
  0xc2   : > { %3186 = vmatmul.mubr.msk.f32.gmra.mxu1 %vm771_vm3, %v3984_v0 }
  0xc3   : > { %3188 = vmatprep.mubr.msk.f32.mxu1 %vm771_vm3, %v3971_v51 }
  0xc4   : > { %3255 = vmatmul.mubr.msk.f32.gmra.mxu0 %vm771_vm3, %v4586_v43 }
  0xc5   : > { %3257 = vmatprep.mubr.msk.f32.mxu0 %vm771_vm3, %v4587_v46 }
  0xc6   : > { %3189 = vmatmul.mubr.msk.f32.gmra.mxu1 %vm771_vm3, %v3974_v54 }
  0xc7   : > { %3219 = vmatprep.mubr.msk.f32.mxu1 %vm771_vm3, %v3740_v3 }
  0xc8   : > { %3258 = vmatmul.mubr.msk.f32.gmra.mxu0 %vm771_vm3, %v3907_v47 }
  0xc9   : > { %3260 = vmatprep.mubr.msk.f32.mxu0 %vm771_vm3, %v3920_v57 }
  0xca   : > { %3220 = vmatmul.mubr.msk.f32.vlgmr.msra.gmra.mxu1 %vm771_vm3, %v3743_v5 }
  0xcb   : > { %3222 = vmatprep.mubr.msk.f32.mxu1 %vm771_vm3, %v3773_v25 }
  0xcc   : > { %3261 = vmatmul.mubr.msk.f32.gmra.mxu0 %vm771_vm3, %v3984_v0 }
  0xcd   : > { %3263 = vmatprep.mubr.msk.f32.mxu0 %vm771_vm3, %v3971_v51 }
  0xce   : > { %3223 = vmatmul.mubr.msk.f32.gmra.mxu1 %vm771_vm3, %v3778_v26 }
  0xcf   : > { %3225 = vmatprep.mubr.msk.f32.mxu1 %vm771_vm3, %v3626_v52 }
  0xd0   : > { %3264 = vmatmul.mubr.msk.f32.gmra.mxu0 %vm771_vm3, %v3974_v54 }
  0xd1   : > { %3266 = vmatprep.mubr.msk.f32.mxu0 %vm771_vm3, %v3957_v63 }
  0xd2   : > { %3226 = vmatmul.mubr.msk.f32.gmra.mxu1 %vm771_vm3, %v3629_v53 }
  0xd3   : > { %3228 = vmatprep.mubr.msk.f32.mxu1 %vm771_vm3, %v3688_v28 }
  0xd4   : > { %3267 = vmatmul.mubr.msk.f32.gmra.mxu0 %vm771_vm3, %v3979_v8 }
  0xd6   : > { %3229 = vmatmul.mubr.msk.f32.gmra.mxu1 %vm771_vm3, %v3701_v36 }
  0xd7   : > { %3231 = vmatprep.mubr.msk.f32.mxu1 %vm771_vm3, %v3752_v10 }
  0xda   : > { %3232 = vmatmul.mubr.msk.f32.gmra.mxu1 %vm771_vm3, %v3761_v16 }
  0xdb   : > { %3234 = vmatprep.mubr.msk.f32.mxu1 %vm771_vm3, %v3874_v34 }
  0xde   : > { %3235 = vmatmul.mubr.msk.f32.gmra.mxu1 %vm771_vm3, %v3877_v33 }
  0xdf   : > { %3237 = vmatprep.mubr.msk.f32.mxu1 %vm771_vm3, %v3965_v37 }
  0xe2   : > { %3238 = vmatmul.mubr.msk.f32.gmra.mxu1 %vm771_vm3, %v3968_v27 }
  0xe3   : > { %3240 = vmatprep.mubr.msk.f32.mxu1 %vm771_vm3, %v3954_v32 }
  0xe6   : > { %3241 = vmatmul.mubr.msk.f32.gmra.mxu1 %vm771_vm3, %v3960_v41 }
 0x101   : > { %v3051_v18 = vpop.f32.mrf.mxu1 }
 0x103   : > { %v914_v42 = vpop.f32.mrf.mxu1 }
 0x107   : > { %v3039_v52 = vpop.f32.mrf.mxu0 }
 0x109   : > { %v874_v53 = vpop.f32.mrf.mxu0  ;;  %v3054_v50 = vpop.f32.mrf.mxu1 }
 0x10b   : > { %v3042_v7 = vpop.f32.mrf.mxu0  ;;  %v924_v9 = vpop.f32.mrf.mxu1 }
 0x10d   : > { %v884_v13 = vpop.f32.mrf.mxu0 }
 0x10f   : > { %v3045_v28 = vpop.f32.mrf.mxu0  ;;  %v3057_v16 = vpop.f32.mrf.mxu1 }
 0x111   : > { %v894_v36 = vpop.f32.mrf.mxu0  ;;  %v934_v39 = vpop.f32.mrf.mxu1 }
 0x113   : > { %v3048_v49 = vpop.f32.mrf.mxu0 }
 0x115   : > { %v904_v56 = vpop.f32.mrf.mxu0 }
 0x117   : > { %v3091_v3 = vpop.f32.mrf.mxu0 }
 0x119   : > { %v1277_v5 = vpop.f32.mrf.mxu0 }
 0x11b   : > { %v3094_v10 = vpop.f32.mrf.mxu0 }
 0x11d   : > { %v1287_v11 = vpop.f32.mrf.mxu0 }
 0x11f   : > { %v3097_v25 = vpop.f32.mrf.mxu0 }
 0x121   : > { %v1297_v26 = vpop.f32.mrf.mxu0 }
 0x123   : > { %v3100_v48 = vpop.f32.mrf.mxu0 }
 0x125   : > { %v1307_v59 = vpop.f32.mrf.mxu0 }
 0x126   : > { %v3060_v58 = vpop.f32.mrf.mxu1 }
 0x127   : > { %v3103_v14 = vpop.f32.mrf.mxu0 }
 0x128   : > { %v4216_v1 = vpop.f32.mrf.mxu1 }
 0x129   : > { %v1317_v21 = vpop.f32.mrf.mxu0 }
 0x12a   : > { %v3065_v29 = vpop.f32.mrf.mxu1 }
 0x12b   : > { %v1060_v31 = vadd.f32 %v3065_v29, %v3039_v52 }
 0x12c   : > { %v1054_v38 = vpop.f32.mrf.mxu1  ;;  %v3106_v45 = vpop.f32.mrf.mxu0 }
 0x12d   : > { %v4218_v51 = vadd.f32 %v3091_v3, %v1060_v31  ;;  %v1055_v34 = vadd.f32 %v1054_v38, %v874_v53 }
 0x12e   : > { %v3068_v33 = vpop.f32.mrf.mxu1  ;;  %v1327_v24 = vpop.f32.mrf.mxu0 }
 0x12f   : > { %v4220_v63 = vadd.f32 %v1277_v5, %v1055_v34  ;;  %v1070_v37 = vadd.f32 %v3068_v33, %v3042_v7 }
 0x130   : > { %v1064_v47 = vpop.f32.mrf.mxu1  ;;  %v3109_v62 = vpop.f32.mrf.mxu0 }
 0x131   : > { %v4222_v15 = vadd.f32 %v3094_v10, %v1070_v37  ;;  %v1065_v57 = vadd.f32 %v1064_v47, %v884_v13 }
 0x132   : > { %v3071_v40 = vpop.f32.mrf.mxu1  ;;  %v1337_v17 = vpop.f32.mrf.mxu0 }
 0x133   : > { %v4224_v4 = vadd.f32 %v1287_v11, %v1065_v57  ;;  %v1080_v22 = vadd.f32 %v3071_v40, %v3045_v28 }
 0x134   : > { %v1074_v23 = vpop.f32.mrf.mxu1  ;;  %v3112_v55 = vpop.f32.mrf.mxu0 }
 0x135   : > { %v4226_v60 = vadd.f32 %v3097_v25, %v1080_v22  ;;  %v1075_v2 = vadd.f32 %v1074_v23, %v894_v36 }
 0x136   : > { %v3074_v20 = vpop.f32.mrf.mxu1  ;;  %v1347_v6 = vpop.f32.mrf.mxu0 }
 0x137   : > { %v4228_v44 = vadd.f32 %v1297_v26, %v1075_v2  ;;  %v1090_v61 = vadd.f32 %v3074_v20, %v3048_v49 }
 0x138   : > { %v1084_v32 = vpop.f32.mrf.mxu1  ;;  %v4230_v41 = vpop.f32.mrf.mxu0 }
 0x139   : > { %v4232_v27 = vadd.f32 %v3100_v48, %v1090_v61  ;;  %v1085_v54 = vadd.f32 %v1084_v32, %v904_v56 }
 0x13a   : > { %v3077_v8 = vpop.f32.mrf.mxu1  ;;  %v4234_v0 = vpop.f32.mrf.mxu0 }
 0x13b   : > { %v4236_v19 = vadd.f32 %v1307_v59, %v1085_v54  ;;  %v1100_v12 = vadd.f32 %v3077_v8, %v3051_v18 }
 0x13c   : > { %v1094_v30 = vpop.f32.mrf.mxu1  ;;  %v4238_v35 = vpop.f32.mrf.mxu0 }
 0x13d   : > { %v4240_v43 = vadd.f32 %v3103_v14, %v1100_v12  ;;  %v1095_v46 = vadd.f32 %v1094_v30, %v914_v42 }
 0x13e   : > { %v3080_v52 = vpop.f32.mrf.mxu1  ;;  %v4242_v53 = vpop.f32.mrf.mxu0 }
 0x13f   : > { %v4244_v7 = vadd.f32 %v1317_v21, %v1095_v46  ;;  %v1110_v13 = vadd.f32 %v3080_v52, %v3054_v50 }
 0x140   : > { %v1104_v28 = vpop.f32.mrf.mxu1  ;;  %v4246_v36 = vpop.f32.mrf.mxu0 }
 0x141   : > { %v4248_v49 = vadd.f32 %v3106_v45, %v1110_v13  ;;  %v1105_v56 = vadd.f32 %v1104_v28, %v924_v9 }
 0x142   : > { %v3083_v3 = vpop.f32.mrf.mxu1  ;;  %v4250_v18 = vpop.f32.mrf.mxu0 }
 0x143   : > { %v4252_v5 = vadd.f32 %v1327_v24, %v1105_v56  ;;  %v1120_v10 = vadd.f32 %v3083_v3, %v3057_v16 }
 0x144   : > { %v1114_v11 = vpop.f32.mrf.mxu1  ;;  %v4254_v42 = vpop.f32.mrf.mxu0 }
 0x145   : > { %v4256_v25 = vadd.f32 %v3109_v62, %v1120_v10  ;;  %v1115_v26 = vadd.f32 %v1114_v11, %v934_v39 }
 0x146   : > { %v3086_v48 = vpop.f32.mrf.mxu1  ;;  %v4258_v50 = vpop.f32.mrf.mxu0 }
 0x147   : > { %v4260_v59 = vadd.f32 %v1337_v17, %v1115_v26  ;;  %v1130_v14 = vadd.f32 %v3086_v48, %v3060_v58 }
 0x148   : > { %v1124_v21 = vpop.f32.mrf.mxu1  ;;  %v4262_v9 = vpop.f32.mrf.mxu0 }
 0x149   : > { %v4264_v29 = vadd.f32 %v3112_v55, %v1130_v14  ;;  %v1125_v31 = vadd.f32 %v1124_v21, %v4216_v1 }
 0x14a   : > { %v3117_v16 = vpop.f32.mrf.mxu1  ;;  %v4267_v38 = vpop.f32.mrf.mxu0 }
 0x14b   : > { %v4269_v45 = vadd.f32 %v1347_v6, %v1125_v31 }
 0x14c   : > { %v1448_v34 = vpop.f32.mrf.mxu1  ;;  %v4271_v39 = vpop.f32.mrf.mxu0 }
 0x14e   : > { %v3120_v33 = vpop.f32.mrf.mxu1  ;;  %v4273_v24 = vpop.f32.mrf.mxu0 }
 0x150   : > { %v1458_v37 = vpop.f32.mrf.mxu1  ;;  %v4275_v58 = vpop.f32.mrf.mxu0 }
 0x151   : > { %4588 = vst [vmem:[#allocation2_spill] sm:$0xff] %v4275_v58 }
 0x152   : > { %v3123_v47 = vpop.f32.mrf.mxu1  ;;  %v4277_v62 = vpop.f32.mrf.mxu0 }
 0x153   : > { %4589 = vst [vmem:[#allocation3_spill] sm:$0xff] %v4277_v62 }
 0x154   : > { %v1468_v57 = vpop.f32.mrf.mxu1  ;;  %v4279_v40 = vpop.f32.mrf.mxu0 }
 0x155   : > { %4590 = vst [vmem:[#allocation4_spill] sm:$0xff] %v4279_v40 }
 0x156   : > { %v3126_v1 = vpop.f32.mrf.mxu1  ;;  %v4281_v17 = vpop.f32.mrf.mxu0 }
 0x157   : > { %4591 = vst [vmem:[#allocation5_spill] sm:$0xff] %v4281_v17 }
 0x158   : > { %v1478_v22 = vpop.f32.mrf.mxu1  ;;  %v4283_v23 = vpop.f32.mrf.mxu0 }
 0x15a   : > { %v3129_v55 = vpop.f32.mrf.mxu1  ;;  %v4285_v2 = vpop.f32.mrf.mxu0 }
 0x15c   : > { %v1488_v20 = vpop.f32.mrf.mxu1  ;;  %v4287_v6 = vpop.f32.mrf.mxu0 }
 0x15e   : > { %v3132_v61 = vpop.f32.mrf.mxu1  ;;  %v4289_v32 = vpop.f32.mrf.mxu0 }
 0x15f   : > { %4592 = vst [vmem:[#allocation6_spill] sm:$0xff] %v4289_v32 }
 0x160   : > { %v1498_v54 = vpop.f32.mrf.mxu1  ;;  %v4291_v8 = vpop.f32.mrf.mxu0 }
 0x161   : > { %4593 = vst [vmem:[#allocation7_spill] sm:$0xff] %v4291_v8 }
 0x162   : > { %v4293_v12 = vpop.f32.mrf.mxu1  ;;  %v4295_v30 = vpop.f32.mrf.mxu0 }
 0x163   : > { %4594 = vst [vmem:[#allocation8_spill] sm:$0xff] %v4295_v30 }
 0x164   : > { %v4297_v46 = vpop.f32.mrf.mxu1  ;;  %v4299_v52 = vpop.f32.mrf.mxu0 }
 0x165   : > { %4595 = vst [vmem:[#allocation9_spill] sm:$0xff] %v4299_v52 }
 0x166   : > { %v4301_v13 = vpop.f32.mrf.mxu1  ;;  %v4303_v28 = vpop.f32.mrf.mxu0 }
 0x167   : > { %4596 = vst [vmem:[#allocation10_spill] sm:$0xff] %v4303_v28 }
 0x168   : > { %v4305_v56 = vpop.f32.mrf.mxu1  ;;  %v4307_v3 = vpop.f32.mrf.mxu0 }
 0x169   : > { %4597 = vst [vmem:[#allocation11_spill] sm:$0xff] %v4307_v3 }
 0x16a   : > { %v3169_v10 = vpop.f32.mrf.mxu1  ;;  %v4309_v11 = vpop.f32.mrf.mxu0 }
 0x16b   : > { %4598 = vst [vmem:[#allocation12_spill] sm:$0xff] %v4309_v11 }
 0x16c   : > { %v1799_v26 = vpop.f32.mrf.mxu1  ;;  %v4311_v48 = vpop.f32.mrf.mxu0 }
 0x16d   : > { %4599 = vst [vmem:[#allocation13_spill] sm:$0xff] %v4311_v48 }
 0x16e   : > { %v3172_v14 = vpop.f32.mrf.mxu1  ;;  %v4313_v21 = vpop.f32.mrf.mxu0 }
 0x16f   : > { %4600 = vst [vmem:[#allocation14_spill] sm:$0xff] %v4313_v21 }
 0x170   : > { %v1809_v31 = vpop.f32.mrf.mxu1  ;;  %v4315_v30 = vpop.f32.mrf.mxu0 }
 0x171   : > { %4601 = vst [vmem:[#allocation15_spill] sm:$0xff] %v4315_v30 }
 0x172   : > { %v4317_v52 = vpop.f32.mrf.mxu1  ;;  %v4319_v8 = vpop.f32.mrf.mxu0 }
 0x173   : > { %4602 = vst [vmem:[#allocation16_spill] sm:$0xff] %v4317_v52  ;;  %4603 = vst [vmem:[#allocation17_spill] sm:$0xff] %v4319_v8 }
 0x174   : > { %v4321_v28 = vpop.f32.mrf.mxu1  ;;  %v4323_v17 = vpop.f32.mrf.mxu0 }
 0x175   : > { %4604 = vst [vmem:[#allocation18_spill] sm:$0xff] %v4321_v28  ;;  %4605 = vst [vmem:[#allocation19_spill] sm:$0xff] %v4323_v17  ;;  %v1528_v17 = vadd.f32 %v3117_v16, %v4218_v51  ;;  %v1529_v51 = vadd.f32 %v1458_v37, %v4224_v4  ;;  %v1535_v4 = vadd.f32 %v1488_v20, %v4244_v7 }
 0x176   : > { %v4325_v3 = vpop.f32.mrf.mxu1  ;;  %v4327_v11 = vpop.f32.mrf.mxu0 }
 0x177   : > { %4606 = vst [vmem:[#allocation20_spill] sm:$0xff] %v4325_v3  ;;  %4607 = vst [vmem:[#allocation21_spill] sm:$0xff] %v4327_v11  ;;  %v1527_v11 = vadd.f32 %v1448_v34, %v4220_v63  ;;  %v1534_v63 = vadd.f32 %v3126_v1, %v4232_v27 }
 0x178   : > { %v4329_v40 = vpop.f32.mrf.mxu1  ;;  %v3247_v48 = vpop.f32.mrf.mxu0 }
 0x179   : > { %4608 = vst [vmem:[#allocation22_spill] sm:$0xff] %v4329_v40 }
 0x17a   : > { %v4331_v62 = vpop.f32.mrf.mxu1  ;;  %v2321_v21 = vpop.f32.mrf.mxu0  ;;  %v4616_v20 = vld [vmem:[#allocation16_spill] sm:$0xff] }
 0x17b   : > { %4609 = vst [vmem:[#allocation23_spill] sm:$0xff] %v4331_v62 }
 0x17c   : > { %v4333_v58 = vpop.f32.mrf.mxu1  ;;  %v4335_v30 = vpop.f32.mrf.mxu0 }
 0x17d   : > { %4610 = vst [vmem:[#allocation24_spill] sm:$0xff] %v4333_v58  ;;  %4611 = vst [vmem:[#allocation25_spill] sm:$0xff] %v4335_v30  ;;  %v1704_v58 = vadd.f32 %v4230_v41, %v1528_v17  ;;  %v1530_v30 = vadd.f32 %v3120_v33, %v4222_v15  ;;  %v1533_v15 = vadd.f32 %v1478_v22, %v4236_v19 }
 0x17e   : > { %v4337_v32 = vpop.f32.mrf.mxu1  ;;  %v4339_v8 = vpop.f32.mrf.mxu0  ;;  %v1710_v19 = vadd.f32 %v4254_v42, %v1534_v63 }
 0x17f   : > { %4612 = vst [vmem:[#allocation26_spill] sm:$0xff] %v4337_v32  ;;  %v1703_v32 = vadd.f32 %v4234_v0, %v1527_v11  ;;  %v1879_v16 = vadd.f32 %v3169_v10, %v1704_v58  ;;  %v1706_v41 = vadd.f32 %v4238_v35, %v1530_v30  ;;  %v1536_v0 = vadd.f32 %v3129_v55, %v4240_v43  ;;  %v4621_v10 = vld [vmem:[#allocation20_spill] sm:$0xff] }
 0x180   : > { %v4342_v28 = vpop.f32.mrf.mxu1  ;;  %v4344_v3 = vpop.f32.mrf.mxu0  ;;  %v1709_v7 = vadd.f32 %v4258_v50, %v1533_v15  ;;  %v1885_v11 = vadd.f32 %v4621_v10, %v1710_v19 }
 0x181   : > { %4613 = vst [vmem:[#allocation27_spill] sm:$0xff] %v4342_v28  ;;  %4614 = vst [vmem:[#allocation28_spill] sm:$0xff] %v4344_v3  ;;  %v1532_v28 = vadd.f32 %v3123_v47, %v4226_v60  ;;  %v1531_v3 = vadd.f32 %v1468_v57, %v4228_v44  ;;  %v1878_v33 = vadd.f32 %v1799_v26, %v1703_v32  ;;  %v4405_v32 = vld [vmem:[%s4570_s6] ss:$0 sm:$0xff] }
 0x182   : > { %v4347_v40 = vpop.f32.mrf.mxu1  ;;  %v4349_v62 = vpop.f32.mrf.mxu0  ;;  %v1705_v60 = vadd.f32 %v4242_v53, %v1529_v51  ;;  %v1538_v44 = vadd.f32 %v3132_v61, %v4248_v49  ;;  %v2050_v27 = vadd.f32 %v4283_v23, %v1879_v16  ;;  %v1881_v58 = vadd.f32 %v3172_v14, %v1706_v41  ;;  %v4623_v16 = vld [vmem:[#allocation4_spill] sm:$0xff]  ;;  %v4624_v41 = vld [vmem:[#allocation5_spill] sm:$0xff] }
 0x183   : > { %4615 = vst [vmem:[#allocation29_spill] sm:$0xff] %v4347_v40  ;;  %v1708_v47 = vadd.f32 %v4246_v36, %v1532_v28  ;;  %v1707_v35 = vadd.f32 %v4250_v18, %v1531_v3  ;;  %v1537_v57 = vadd.f32 %v1498_v54, %v4252_v5  ;;  %v2049_v53 = vadd.f32 %v4285_v2, %v1878_v33  ;;  %v4390_v5 = vld [vmem:[%s4569_s5] ss:$0 sm:$0xff]  ;;  %v4625_v33 = vld [vmem:[#allocation7_spill] sm:$0xff] }
 0x184   : > { %v4353_v52 = vpop.f32.mrf.mxu1  ;;  %v4362_v40 = vpop.f32.mrf.mxu0  ;;  %v1880_v17 = vadd.f32 %v1809_v31, %v1705_v60  ;;  %v1712_v22 = vadd.f32 %v4262_v9, %v1536_v0  ;;  %v1711_v23 = vadd.f32 %v4267_v38, %v1535_v4  ;;  %v1540_v36 = vadd.f32 %v4293_v12, %v4256_v25  ;;  %v4617_v54 = vld [vmem:[#allocation6_spill] sm:$0xff]  ;;  %v4622_v31 = vld [vmem:[#allocation25_spill] sm:$0xff] }
 0x185   : > { %v1539_v18 = vadd.f32 %v4297_v46, %v4260_v59  ;;  %v1714_v50 = vadd.f32 %v4271_v39, %v1538_v44  ;;  %v2052_v55 = vadd.f32 %v4287_v6, %v1881_v58  ;;  %v4395_v38 = vadd.f32 %v4273_v24, %v1537_v57  ;;  %v4626_v4 = vld [vmem:[#allocation22_spill] sm:$0xff]  ;;  %v4627_v57 = vld [vmem:[#allocation8_spill] sm:$0xff] }
 0x186   : > { %v4360_v34 = vpop.f32.mrf.mxu1  ;;  %v4377_v1 = vpop.f32.mrf.mxu0  ;;  %v1542_v25 = vadd.f32 %v4301_v13, %v4264_v29  ;;  %v1541_v59 = vadd.f32 %v4305_v56, %v4269_v45  ;;  %v1883_v61 = vadd.f32 %v4616_v20, %v1708_v47  ;;  %v2051_v12 = vadd.f32 %v4617_v54, %v1880_v17  ;;  %v4618_v29 = vld [vmem:[#allocation2_spill] sm:$0xff]  ;;  %v4619_v45 = vld [vmem:[#allocation3_spill] sm:$0xff]  ;;  %v4631_v20 = vld [vmem:[#allocation24_spill] sm:$0xff] }
 0x187   : > { %v4412_v13 = vadd.f32 %v4618_v29, %v1540_v36  ;;  %v4415_v28 = vadd.f32 %v4619_v45, %v1539_v18  ;;  %v4620_v56 = vld [vmem:[#allocation18_spill] sm:$0xff]  ;;  %v1884_v60 = vadd.f32 %v4626_v4, %v1709_v7  ;;  %v4629_v17 = vld [vmem:[#allocation23_spill] sm:$0xff] }
 0x188   : > { %v4368_v37 = vpop.f32.mrf.mxu1  ;;  %v4407_v6 = vpop.f32.mrf.mxu0  ;;  %v1882_v3 = vadd.f32 %v4620_v56, %v1707_v35  ;;  %v4423_v63 = vadd.f32 %v4623_v16, %v1542_v25  ;;  %v4426_v15 = vadd.f32 %v4624_v41, %v1541_v59  ;;  %v2054_v0 = vadd.f32 %v4625_v33, %v1883_v61  ;;  %v4630_v25 = vld [vmem:[#allocation10_spill] sm:$0xff]  ;;  %v4635_v33 = vld [vmem:[#allocation12_spill] sm:$0xff]  ;;  %v4636_v4 = vld [vmem:[#allocation27_spill] sm:$0xff] }
 0x189   : > { %v2055_v59 = vadd.f32 %v4630_v25, %v1884_v60  ;;  %v1886_v61 = vadd.f32 %v4631_v20, %v1711_v23 }
 0x18a   : > { %v3221_v43 = vpop.f32.mrf.mxu1 }
 0x18b   : > { %v2226_v49 = vadd.f32 %v3221_v43, %v2050_v27  ;;  %v4430_v27 = vpop.f32.mrf.mxu0  ;;  %v2053_v43 = vadd.f32 %v4627_v57, %v1882_v3  ;;  %v4633_v3 = vld [vmem:[#allocation11_spill] sm:$0xff] }
 0x18c   : > { %v2146_v42 = vpop.f32.mrf.mxu1 }
 0x18d   : > { %v2401_v2 = vadd.f32 %v3247_v48, %v2226_v49  ;;  %v2225_v9 = vadd.f32 %v2146_v42, %v2049_v53  ;;  %v4628_v53 = vld [vmem:[#allocation9_spill] sm:$0xff]  ;;  %v1887_v49 = vadd.f32 %v4629_v17, %v1712_v22  ;;  %v3391_v42 = vld [vmem:[%s3581_s14 + $0x8] sm:$0xff]  ;;  %v4450_v22 = vpop.f32.mrf.mxu0 }
 0x18e   : > { %v3224_v39 = vpop.f32.mrf.mxu1  ;;  %v2056_v7 = vadd.f32 %v4628_v53, %v1885_v11  ;;  %v4634_v11 = vld [vmem:[#allocation26_spill] sm:$0xff] }
 0x18f   : > { %v2424_v24 = vmul.f32 %v4390_v5, %v2401_v2  ;;  %v2400_v30 = vadd.f32 %v2321_v21, %v2225_v9  ;;  %v2228_v46 = vadd.f32 %v3224_v39, %v2052_v55  ;;  %v4632_v39 = vld [vmem:[#allocation28_spill] sm:$0xff]  ;;  %v2058_v10 = vadd.f32 %v4633_v3, %v1887_v49 }
 0x190   : > { %v2156_v26 = vpop.f32.mrf.mxu1  ;;  %v1889_v23 = vadd.f32 %v4634_v11, %v1714_v50  ;;  %v1888_v50 = vadd.f32 %v4636_v4, %v4395_v38  ;;  %v4638_v38 = vld [vmem:[#allocation29_spill] sm:$0xff] }
 0x191   : > { %v2447_v48 = vadd.f32 %v4405_v32, %v2424_v24  ;;  %v2423_v14 = vmul.f32 %v4390_v5, %v2400_v30  ;;  %v2403_v51 = vadd.f32 %v4622_v31, %v2228_v46  ;;  %v2227_v21 = vadd.f32 %v2156_v26, %v2051_v12  ;;  %v3392_v30 = vld [vmem:[%s3581_s14] sm:$0xff]  ;;  %v3393_v31 = vld [vmem:[%s3581_s14 + $0x18] sm:$0xff] }
 0x192   : > { %v3227_v44 = vpop.f32.mrf.mxu1 }
 0x193   : > { %v2463_v58 = vmax.f32 %v2447_v48, 0.0  ;;  %v2446_v47 = vadd.f32 %v4405_v32, %v2423_v14  ;;  %v2426_v35 = vmul.f32 %v4390_v5, %v2403_v51  ;;  %v2402_v19 = vadd.f32 %v4339_v8, %v2227_v21 }
 0x194   : > { %v2230_v36 = vadd.f32 %v3227_v44, %v2054_v0  ;;  %v2166_v18 = vpop.f32.mrf.mxu1  ;;  %v2057_v0 = vadd.f32 %v4635_v33, %v1886_v61 }
 0x195   : > { %v2479_v55 = vadd.f32 %v3391_v42, %v2463_v58  ;;  %v2462_v2 = vmax.f32 %v2446_v47, 0.0  ;;  %v2449_v8 = vadd.f32 %v4405_v32, %v2426_v35  ;;  %v2425_v9 = vmul.f32 %v4390_v5, %v2402_v19  ;;  %v2371_v58 = vpop.f32.mrf.mxu0  ;;  %v3394_v47 = vld [vmem:[%s3581_s14 + $0x10] sm:$0xff] }
 0x196   : > { %v2405_v54 = vadd.f32 %v4632_v39, %v2230_v36  ;;  %v2229_v12 = vadd.f32 %v2166_v18, %v2053_v43  ;;  %v3230_v24 = vpop.f32.mrf.mxu1  ;;  %v4637_v43 = vld [vmem:[#allocation13_spill] sm:$0xff] }
 0x197   : > { %2495 = vst.msk [vmem:[%s4439_s21 + $0x8] sm:$0xff] %vm771_vm3, %v2479_v55  ;;  %v2478_v46 = vadd.f32 %v3392_v30, %v2462_v2  ;;  %v2465_v29 = vmax.f32 %v2449_v8, 0.0  ;;  %v2448_v45 = vadd.f32 %v4405_v32, %v2425_v9  ;;  %v2232_v56 = vadd.f32 %v3230_v24, %v2056_v7  ;;  %v4639_v2 = vld [vmem:[#allocation14_spill] sm:$0xff]  ;;  %v3395_v9 = vld [vmem:[%s3581_s14 + $0x28] sm:$0xff]  ;;  %v3265_v61 = vpop.f32.mrf.mxu0 }
 0x198   : > { %v2428_v26 = vmul.f32 %v4390_v5, %v2405_v54  ;;  %v2404_v48 = vadd.f32 %v4349_v62, %v2229_v12  ;;  %v2176_v14 = vpop.f32.mrf.mxu1  ;;  %v2060_v53 = vadd.f32 %v4637_v43, %v1889_v23  ;;  %v1891_v7 = vadd.f32 %v4638_v38, %v4412_v13  ;;  %v4640_v24 = vld [vmem:[#allocation15_spill] sm:$0xff]  ;;  %v4641_v23 = vld [vmem:[#allocation17_spill] sm:$0xff] }
 0x199   : > { %2494 = vst.msk [vmem:[%s4439_s21] sm:$0xff] %vm771_vm3, %v2478_v46  ;;  %v2481_v51 = vadd.f32 %v3393_v31, %v2465_v29  ;;  %v2464_v21 = vmax.f32 %v2448_v45, 0.0  ;;  %v2407_v16 = vadd.f32 %v4362_v40, %v2232_v56  ;;  %v2231_v41 = vadd.f32 %v2176_v14, %v2055_v59  ;;  %v3397_v56 = vld [vmem:[%s3581_s14 + $0x38] sm:$0xff]  ;;  %v2381_v31 = vpop.f32.mrf.mxu0 }
 0x19a   : > { %v2451_v60 = vadd.f32 %v4405_v32, %v2428_v26  ;;  %v2427_v44 = vmul.f32 %v4390_v5, %v2404_v48  ;;  %v3233_v62 = vpop.f32.mrf.mxu1  ;;  %v2059_v8 = vadd.f32 %v4639_v2, %v1888_v50  ;;  %v1890_v13 = vadd.f32 %v4353_v52, %v4415_v28  ;;  %v3396_v52 = vld [vmem:[%s3581_s14 + $0x20] sm:$0xff] }
 0x19b   : > { %2497 = vst.msk [vmem:[%s4439_s21 + $0x18] sm:$0xff] %vm771_vm3, %v2481_v51  ;;  %v2480_v35 = vadd.f32 %v3394_v47, %v2464_v21  ;;  %v2430_v40 = vmul.f32 %v4390_v5, %v2407_v16  ;;  %v2406_v19 = vadd.f32 %v4377_v1, %v2231_v41  ;;  %v2234_v57 = vadd.f32 %v3233_v62, %v2058_v10  ;;  %v3398_v51 = vld [vmem:[%s3581_s14 + $0x30] sm:$0xff] }
 0x19c   : > { %v2467_v17 = vmax.f32 %v2451_v60, 0.0  ;;  %v2450_v49 = vadd.f32 %v4405_v32, %v2427_v44  ;;  %v2186_v36 = vpop.f32.mrf.mxu1  ;;  %v2062_v30 = vadd.f32 %v4640_v24, %v1891_v7  ;;  %v1893_v46 = vadd.f32 %v4360_v34, %v4423_v63  ;;  %v3403_v24 = vld [vmem:[%s3581_s14 + $0x68] sm:$0xff] }
 0x19d   : > { %2496 = vst.msk [vmem:[%s4439_s21 + $0x10] sm:$0xff] %vm771_vm3, %v2480_v35  ;;  %v2453_v18 = vadd.f32 %v4405_v32, %v2430_v40  ;;  %v2429_v42 = vmul.f32 %v4390_v5, %v2406_v19  ;;  %v2409_v55 = vadd.f32 %v4407_v6, %v2234_v57  ;;  %v2233_v1 = vadd.f32 %v2186_v36, %v2057_v0  ;;  %v4642_v0 = vld [vmem:[#allocation19_spill] sm:$0xff]  ;;  %v4643_v35 = vld [vmem:[#allocation21_spill] sm:$0xff] }
 0x19e   : > { %v2483_v25 = vadd.f32 %v3395_v9, %v2467_v17  ;;  %v2466_v59 = vmax.f32 %v2450_v49, 0.0  ;;  %v3236_v20 = vpop.f32.mrf.mxu1  ;;  %v2061_v26 = vadd.f32 %v4641_v23, %v1890_v13  ;;  %v1892_v34 = vadd.f32 %v4368_v37, %v4426_v15  ;;  %v3401_v13 = vld [vmem:[%s3581_s14 + $0x58] sm:$0xff]  ;;  %v3406_v23 = vld [vmem:[%s3581_s14 + $0x70] sm:$0xff] }
 0x19f   : > { %v2469_v39 = vmax.f32 %v2453_v18, 0.0  ;;  %v2452_v54 = vadd.f32 %v4405_v32, %v2429_v42  ;;  %v2432_v12 = vmul.f32 %v4390_v5, %v2409_v55  ;;  %v2408_v6 = vadd.f32 %v4430_v27, %v2233_v1 }
 0x1a0   : > { %2499 = vst.msk [vmem:[%s4439_s21 + $0x28] sm:$0xff] %vm771_vm3, %v2483_v25  ;;  %v2482_v28 = vadd.f32 %v3396_v52, %v2466_v59  ;;  %v2236_v29 = vadd.f32 %v3236_v20, %v2060_v53  ;;  %v2196_v45 = vpop.f32.mrf.mxu1  ;;  %v2064_v37 = vadd.f32 %v4642_v0, %v1893_v46  ;;  %v2063_v40 = vadd.f32 %v4643_v35, %v1892_v34  ;;  %v3268_v53 = vpop.f32.mrf.mxu0 }
 0x1a1   : > { %v2485_v3 = vadd.f32 %v3397_v56, %v2469_v39  ;;  %v2468_v10 = vmax.f32 %v2452_v54, 0.0  ;;  %v2455_v11 = vadd.f32 %v4405_v32, %v2432_v12  ;;  %v2431_v27 = vmul.f32 %v4390_v5, %v2408_v6  ;;  %v3402_v12 = vld [vmem:[%s3581_s14 + $0x50] sm:$0xff] }
 0x1a2   : > { %2498 = vst.msk [vmem:[%s4439_s21 + $0x20] sm:$0xff] %vm771_vm3, %v2482_v28  ;;  %v2411_v63 = vadd.f32 %v4450_v22, %v2236_v29  ;;  %v2235_v48 = vadd.f32 %v2196_v45, %v2059_v8  ;;  %v3239_v14 = vpop.f32.mrf.mxu1  ;;  %v3399_v22 = vld [vmem:[%s3581_s14 + $0x48] sm:$0xff]  ;;  %v2391_v59 = vpop.f32.mrf.mxu0  ;;  %v3404_v29 = vld [vmem:[%s3581_s14 + $0x60] sm:$0xff] }
 0x1a3   : > { %2501 = vst.msk [vmem:[%s4439_s21 + $0x38] sm:$0xff] %vm771_vm3, %v2485_v3  ;;  %v2484_v21 = vadd.f32 %v3398_v51, %v2468_v10  ;;  %v2471_v16 = vmax.f32 %v2455_v11, 0.0  ;;  %v2454_v41 = vadd.f32 %v4405_v32, %v2431_v27  ;;  %v2238_v33 = vadd.f32 %v3239_v14, %v2062_v30  ;;  %v3405_v10 = vld [vmem:[%s3581_s14 + $0x78] sm:$0xff] }
 0x1a4   : > { %v2434_v15 = vmul.f32 %v4390_v5, %v2411_v63  ;;  %v2410_v4 = vadd.f32 %v2371_v58, %v2235_v48  ;;  %v2206_v50 = vpop.f32.mrf.mxu1  ;;  %v3400_v58 = vld [vmem:[%s3581_s14 + $0x40] sm:$0xff] }
 0x1a5   : > { %2500 = vst.msk [vmem:[%s4439_s21 + $0x30] sm:$0xff] %vm771_vm3, %v2484_v21  ;;  %v2487_v60 = vadd.f32 %v3399_v22, %v2471_v16  ;;  %v2470_v44 = vmax.f32 %v2454_v41, 0.0  ;;  %v2413_v62 = vadd.f32 %v3265_v61, %v2238_v33  ;;  %v2237_v47 = vadd.f32 %v2206_v50, %v2061_v26 }
 0x1a6   : > { %v2457_v19 = vadd.f32 %v4405_v32, %v2434_v15  ;;  %v2433_v57 = vmul.f32 %v4390_v5, %v2410_v4  ;;  %v3242_v43 = vpop.f32.mrf.mxu1 }
 0x1a7   : > { %2503 = vst.msk [vmem:[%s4439_s21 + $0x48] sm:$0xff] %vm771_vm3, %v2487_v60  ;;  %v2486_v38 = vadd.f32 %v3400_v58, %v2470_v44  ;;  %v2436_v7 = vmul.f32 %v4390_v5, %v2413_v62  ;;  %v2412_v17 = vadd.f32 %v2381_v31, %v2237_v47  ;;  %v2240_v49 = vadd.f32 %v3242_v43, %v2064_v37 }
 0x1a8   : > { %v2473_v36 = vmax.f32 %v2457_v19, 0.0  ;;  %v2456_v18 = vadd.f32 %v4405_v32, %v2433_v57  ;;  %v2216_v42 = vpop.f32.mrf.mxu1 }
 0x1a9   : > { %2502 = vst.msk [vmem:[%s4439_s21 + $0x40] sm:$0xff] %vm771_vm3, %v2486_v38  ;;  %v2459_v55 = vadd.f32 %v4405_v32, %v2436_v7  ;;  %v2435_v1 = vmul.f32 %v4390_v5, %v2412_v17  ;;  %v2415_v2 = vadd.f32 %v3268_v53, %v2240_v49  ;;  %v2239_v8 = vadd.f32 %v2216_v42, %v2063_v40 }
 0x1aa   : > { %v2489_v9 = vadd.f32 %v3401_v13, %v2473_v36  ;;  %v2472_v25 = vmax.f32 %v2456_v18, 0.0 }
 0x1ab   : > { %v2475_v20 = vmax.f32 %v2459_v55, 0.0  ;;  %v2458_v61 = vadd.f32 %v4405_v32, %v2435_v1  ;;  %v2438_v39 = vmul.f32 %v4390_v5, %v2415_v2  ;;  %v2414_v54 = vadd.f32 %v2391_v59, %v2239_v8 }
 0x1ac   : > { %2505 = vst.msk [vmem:[%s4439_s21 + $0x58] sm:$0xff] %vm771_vm3, %v2489_v9  ;;  %v2488_v6 = vadd.f32 %v3402_v12, %v2472_v25 }
 0x1ad   : > { %v2491_v30 = vadd.f32 %v3403_v24, %v2475_v20  ;;  %v2474_v46 = vmax.f32 %v2458_v61, 0.0  ;;  %v2461_v52 = vadd.f32 %v4405_v32, %v2438_v39  ;;  %v2437_v28 = vmul.f32 %v4390_v5, %v2414_v54 }
 0x1ae   : > { %2504 = vst.msk [vmem:[%s4439_s21 + $0x50] sm:$0xff] %vm771_vm3, %v2488_v6 }
 0x1af   : > { %2507 = vst.msk [vmem:[%s4439_s21 + $0x68] sm:$0xff] %vm771_vm3, %v2491_v30  ;;  %v2490_v45 = vadd.f32 %v3404_v29, %v2474_v46  ;;  %v2477_v56 = vmax.f32 %v2461_v52, 0.0  ;;  %v2460_v3 = vadd.f32 %v4405_v32, %v2437_v28 }
 0x1b1   : > { %2506 = vst.msk [vmem:[%s4439_s21 + $0x60] sm:$0xff] %vm771_vm3, %v2490_v45  ;;  %v2493_v11 = vadd.f32 %v3405_v10, %v2477_v56  ;;  %v2476_v27 = vmax.f32 %v2460_v3, 0.0 }
 0x1b3   : > { %2509 = vst.msk [vmem:[%s4439_s21 + $0x78] sm:$0xff] %vm771_vm3, %v2493_v11  ;;  %v2492_v26 = vadd.f32 %v3406_v23, %v2476_v27 }
 0x1b5   : > { %2508 = vst.msk [vmem:[%s4439_s21 + $0x70] sm:$0xff] %vm771_vm3, %v2492_v26 }
 0x1b6 PF: > { %s17_s28 = sadd.s32 1, %s3445_s28   ;;  %s4644_s24 = smov %s3437_s26 }
 0x1b7   : > { %p14_p8 = scmp.ge.s32.totalorder %s17_s28, 6   ;;  %s4645_s25 = smov %s3441_s27 }
 0x1b8   : > { %s4646_s26 = smov %s4649_s29  ;;  %s4647_s27 = smov %s4653_s30 }
 0x1b9   :  { %16 = sbr.rel (!%p14_p8) target bundleno = 3 (0x3), region = 95 }

</bundles_post_ra>
